<compile_context>
chip_gen: v6e
topology: v6e:2x2x1
jax: 0.10.0
libtpu: 0.0.40
codegen_flags: <defaults>
</compile_context>

<pallas_src>
import functools

import jax
import jax.numpy as jnp
from jax.experimental import pallas as pl
from jax.experimental.pallas import tpu as pltpu

_NEG_INF = -1e30


# ----------------------------------------------------------------------------
# Kernel 1 (per row block):
#   h  = relu( d_blk * ((A+I)_blk @ (D^-1/2 XW1)) + b1 )
#   hw = d_blk * (h @ W2_pad)            # pre-scaled for the layer-2 aggregation
# ----------------------------------------------------------------------------
def gcn_layer1_kernel(adj_ref, dinv_ref, xw1_ref, b1_ref, w2p_ref, out_ref):
    # int8 -> f32 -> bf16: integer multiplicities are exact; two-step convert is
    # the safe Mosaic lowering path for narrow-int sources.
    adj = adj_ref[...].astype(jnp.float32).astype(jnp.bfloat16)
    agg = jnp.dot(adj, xw1_ref[...],
                  preferred_element_type=jnp.float32)            # [TM, H] f32
    h = jnp.maximum(agg * dinv_ref[...] + b1_ref[...], 0.0)      # bias + ReLU
    # TODO(synk): training-mode dropout (pltpu.prng_seed / prng_random_bits)
    # would go here; the module runs in eval mode so it is the identity.
    hw = jnp.dot(h.astype(jnp.bfloat16), w2p_ref[...],
                 preferred_element_type=jnp.float32)             # [TM, CP] f32
    out_ref[...] = (hw * dinv_ref[...]).astype(out_ref.dtype)


# ----------------------------------------------------------------------------
# Kernel 2 (per row block):
#   z = d_blk * ((A+I)_blk @ hw) + b2_pad ; out = log_softmax(z)
#   (b2_pad carries -1e30 on padded class columns -> they vanish from softmax)
# ----------------------------------------------------------------------------
def gcn_layer2_kernel(adj_ref, dinv_ref, hw_ref, b2p_ref, out_ref):
    adj = adj_ref[...].astype(jnp.float32).astype(jnp.bfloat16)
    z = jnp.dot(adj, hw_ref[...],
                preferred_element_type=jnp.float32)              # [TM, CP] f32
    z = z * dinv_ref[...] + b2p_ref[...]
    m = jnp.max(z, axis=1, keepdims=True)                        # [TM, 1]
    s = jnp.sum(jnp.exp(z - m), axis=1, keepdims=True)           # [TM, 1]
    out_ref[...] = (z - m - jnp.log(s)).astype(out_ref.dtype)


# ----------------------------------------------------------------------------
# Unified VMEM accounting: one budget drives both the TM choice and
# vmem_limit_bytes.
# ----------------------------------------------------------------------------
def _vmem_capacity_bytes():
    try:
        return int(pltpu.get_tpu_info().vmem_capacity_bytes)  # 64 MiB v7x, 128 MiB v5e/v6e
    except Exception:
        return 64 * 1024 * 1024


def _choose_tm(n, h, cp, budget):
    """Largest row block (multiple of 128, <= 512) whose per-step footprint fits
    the VMEM budget and that leaves >= 4 grid steps for DMA/compute overlap."""
    if n <= 256:
        return n

    def footprint(tm):
        adj = 2 * tm * n * 1                       # int8 A row block, x2 buffers
        dinv = 2 * tm * 128 * 4                    # [tm,1] f32 tile (lane padded)
        out1 = 2 * tm * cp * 2                     # bf16 hw output tile
        out2 = 2 * tm * cp * 4                     # f32 log-softmax output tile
        const1 = n * h * 2 + h * cp * 2 + 8 * 128 * 4   # XW1s, W2p, b1 (Buffered(1))
        const2 = n * cp * 2 + 8 * 128 * 4               # hw, b2p (Buffered(1))
        scratch = 2 * tm * max(h, cp) * 4          # in-kernel f32 temporaries
        return max(adj + dinv + out1 + const1,
                   adj + dinv + out2 + const2) + scratch

    tm = 512
    while tm > 128 and (footprint(tm) > budget or pl.cdiv(n, tm) < 4):
        tm -= 128
    return tm


# ----------------------------------------------------------------------------
# Wrapper
# ----------------------------------------------------------------------------
def gcn_forward(adj_i8, d_inv_sqrt, x, w1, b1, w2, b2, *, tm=None):
    """adj_i8: [N,N] int8 (A+I multiplicities), d_inv_sqrt: [N] f32,
    x: [N,F], w1: [F,H], b1: [1,H], w2: [H,C], b2: [1,C]."""
    N, F = x.shape
    H = w1.shape[1]
    C = w2.shape[1]
    CP = max(128, ((C + 127) // 128) * 128)        # lane-dense padded classes

    cap = _vmem_capacity_bytes()
    budget = (3 * cap) // 4
    if tm is None:
        tm = _choose_tm(N, H, CP, budget)
    grid = (pl.cdiv(N, tm),)

    # Hoisted tiny feature matmul, with the left D^-1/2 folded in (f32, once).
    xw1s = (d_inv_sqrt[:, None] *
            (x.astype(jnp.float32) @ w1.astype(jnp.float32))).astype(jnp.bfloat16)
    dinv = d_inv_sqrt.astype(jnp.float32).reshape(N, 1)
    w2p = jnp.zeros((H, CP), jnp.bfloat16).at[:, :C].set(w2.astype(jnp.bfloat16))
    b1_f = b1.astype(jnp.float32).reshape(1, H)
    # Padded class columns carry -inf bias (their hw columns are exactly 0).
    b2p = jnp.full((1, CP), _NEG_INF, jnp.float32).at[:, :C].set(
        b2.astype(jnp.float32).reshape(1, C))

    cparams = pltpu.CompilerParams(
        dimension_semantics=("parallel",),          # megacore sharding on v7x
        vmem_limit_bytes=int(budget),
    )

    row_blk = lambda i: (i, 0)
    rep = lambda i: (0, 0)

    # --- layer 1 (+ layer-2 feature projection), row-block tiled --------------
    hw = pl.pallas_call(
        gcn_layer1_kernel,
        out_shape=jax.ShapeDtypeStruct((N, CP), jnp.bfloat16),
        grid=grid,
        in_specs=[
            pl.BlockSpec((tm, N), row_blk),                                   # A+I row block (int8)
            pl.BlockSpec((tm, 1), row_blk),                                   # D^-1/2 row block
            pl.BlockSpec((N, H), rep, pipeline_mode=pl.Buffered(1)),          # D^-1/2 XW1
            pl.BlockSpec((1, H), rep, pipeline_mode=pl.Buffered(1)),          # b1
            pl.BlockSpec((H, CP), rep, pipeline_mode=pl.Buffered(1)),         # W2 (padded)
        ],
        out_specs=pl.BlockSpec((tm, CP), row_blk),
        compiler_params=cparams,
    )(adj_i8, dinv, xw1s, b1_f, w2p)

    # --- layer 2 aggregation + bias + log_softmax, row-block tiled ------------
    # TODO(synk): for very large N add a K-axis contraction grid (f32 VMEM
    # accumulator + pl.when init/finalize) so the replicated hw input and the
    # adjacency row tiles stay bounded regardless of N.
    out_p = pl.pallas_call(
        gcn_layer2_kernel,
        out_shape=jax.ShapeDtypeStruct((N, CP), jnp.float32),
        grid=grid,
        in_specs=[
            pl.BlockSpec((tm, N), row_blk),                                   # A+I row block (int8)
            pl.BlockSpec((tm, 1), row_blk),                                   # D^-1/2 row block
            pl.BlockSpec((N, CP), rep, pipeline_mode=pl.Buffered(1)),         # hw (pre-scaled)
            pl.BlockSpec((1, CP), rep, pipeline_mode=pl.Buffered(1)),         # b2 (padded, masked)
        ],
        out_specs=pl.BlockSpec((tm, CP), row_blk),
        compiler_params=cparams,
    )(adj_i8, dinv, hw, b2p)

    return out_p[:, :C]


# ----------------------------------------------------------------------------
# Glue: build the graph operands once, directly in the compute dtypes.
#  - scatter-ADD so duplicate edges keep their multiplicity,
#  - add_remaining_self_loops (self-loop only where missing),
#  - A+I kept as exact int8 counts; D^-1/2 kept separately in f32.
# ----------------------------------------------------------------------------
def build_graph_operands(edge_index, num_nodes):
    src = edge_index[0]
    dst = edge_index[1]
    # A[i, j] = number of edges j -> i (aggregate from source into target).
    counts = jnp.zeros((num_nodes, num_nodes), jnp.int32).at[dst, src].add(1)
    diag = jnp.diagonal(counts)
    counts = counts + jnp.diag(jnp.where(diag > 0, 0, 1))  # remaining self-loops
    deg = jnp.sum(counts, axis=1).astype(jnp.float32)
    d_inv_sqrt = jnp.where(deg > 0, jax.lax.rsqrt(deg), 0.0)
    # Edge multiplicities are tiny; int8 stores them exactly (clip is a no-op
    # for realistic graphs, guards against pathological duplicate counts).
    adj_i8 = jnp.clip(counts, 0, 127).astype(jnp.int8)
    return adj_i8, d_inv_sqrt


def reference_forward(adj, x, w1, b1, w2, b2):
    h = jnp.maximum(adj @ (x @ w1) + b1, 0.0)
    z = adj @ (h @ w2) + b2
    return jax.nn.log_softmax(z, axis=1)


if __name__ == "__main__":
    key = jax.random.PRNGKey(0)

    num_nodes = 1024
    num_features = 16
    hidden_channels = 32
    num_classes = 8
    num_edges = 4096

    k_x, k_e1, k_e2, k_w1, k_w2, k_b1, k_b2 = jax.random.split(key, 7)

    x = jax.random.normal(k_x, (num_nodes, num_features), dtype=jnp.float32)
    src = jax.random.randint(k_e1, (num_edges,), 0, num_nodes)
    dst = jax.random.randint(k_e2, (num_edges,), 0, num_nodes)
    edge_index = jnp.stack([src, dst], axis=0)                 # [2, E]

    # GCNConv-style params: weight [in, out], bias [out]
    w1 = (jax.random.normal(k_w1, (num_features, hidden_channels), jnp.float32)
          * (1.0 / jnp.sqrt(num_features)))
    b1 = 0.1 * jax.random.normal(k_b1, (1, hidden_channels), jnp.float32)
    w2 = (jax.random.normal(k_w2, (hidden_channels, num_classes), jnp.float32)
          * (1.0 / jnp.sqrt(hidden_channels)))
    b2 = 0.1 * jax.random.normal(k_b2, (1, num_classes), jnp.float32)

    adj_i8, d_inv_sqrt = build_graph_operands(edge_index, num_nodes)

    out = gcn_forward(adj_i8, d_inv_sqrt, x, w1, b1, w2, b2)
    out = jax.block_until_ready(out)

    # sanity: shape, softmax rows sum to ~1, and agreement with f32 reference
    assert out.shape == (num_nodes, num_classes)
    row_sums = jnp.sum(jnp.exp(out), axis=1)
    assert bool(jnp.all(jnp.abs(row_sums - 1.0) < 1e-3))

    a_hat = d_inv_sqrt[:, None] * adj_i8.astype(jnp.float32) * d_inv_sqrt[None, :]
    ref = reference_forward(a_hat, x, w1, b1, w2, b2)
    max_err = float(jnp.max(jnp.abs(out - ref)))
    assert max_err < 0.15, f"max abs diff vs reference: {max_err}"

    print("KERNEL_OK")
</pallas_src>

<mosaic_0001>
module attributes {stable_mosaic.version = 11 : i64} {
  func.func @gcn_layer1_kernel(%arg0: i32, %arg1: memref<256x1024xi8, #tpu.memory_space<vmem>>, %arg2: memref<256x1xf32, #tpu.memory_space<vmem>>, %arg3: memref<1024x32xbf16, #tpu.memory_space<vmem>>, %arg4: memref<1x32xf32, #tpu.memory_space<vmem>>, %arg5: memref<32x128xbf16, #tpu.memory_space<vmem>>, %arg6: memref<256x128xbf16, #tpu.memory_space<vmem>>) attributes {dimension_semantics = [#tpu.dimension_semantics<parallel>], iteration_bounds = array<i64: 4>, scalar_prefetch = 0 : i64, scratch_operands = 0 : i64, tpu.core_type = #tpu.core_type<tc>, window_params = [{transform_indices = @transform_0, window_bounds = array<i64: 256, 1024>}, {transform_indices = @transform_1, window_bounds = array<i64: 256, 1>}, {pipeline_mode = #tpu.pipeline_mode<synchronous>, transform_indices = @transform_2, window_bounds = array<i64: 1024, 32>}, {pipeline_mode = #tpu.pipeline_mode<synchronous>, transform_indices = @transform_3, window_bounds = array<i64: 1, 32>}, {pipeline_mode = #tpu.pipeline_mode<synchronous>, transform_indices = @transform_4, window_bounds = array<i64: 32, 128>}, {transform_indices = @transform_5, window_bounds = array<i64: 256, 128>}]} {
    %c0 = arith.constant 0 : index
    %c0_0 = arith.constant 0 : index
    %0 = vector.load %arg1[%c0, %c0_0] : memref<256x1024xi8, #tpu.memory_space<vmem>>, vector<256x1024xi8>
    %1 = arith.sitofp %0 : vector<256x1024xi8> to vector<256x1024xf32>
    %2 = arith.truncf %1 : vector<256x1024xf32> to vector<256x1024xbf16>
    %c0_1 = arith.constant 0 : index
    %c0_2 = arith.constant 0 : index
    %3 = vector.load %arg3[%c0_1, %c0_2] : memref<1024x32xbf16, #tpu.memory_space<vmem>>, vector<1024x32xbf16>
    %cst = arith.constant dense<0.000000e+00> : vector<256x32xf32>
    %4 = tpu.matmul %2, %3, %cst {dimension_numbers = #tpu.dot_dimension_numbers<[1], [0], [0], [1], [0, 0, 1, 1], [], []>} : vector<256x1024xbf16>, vector<1024x32xbf16>, vector<256x32xf32> -> vector<256x32xf32>
    %c0_3 = arith.constant 0 : index
    %c0_4 = arith.constant 0 : index
    %5 = vector.load %arg2[%c0_3, %c0_4] : memref<256x1xf32, #tpu.memory_space<vmem>>, vector<256x1xf32>
    %6 = vector.broadcast %5 : vector<256x1xf32> to vector<256x32xf32>
    %7 = arith.mulf %4, %6 : vector<256x32xf32>
    %c0_5 = arith.constant 0 : index
    %c0_6 = arith.constant 0 : index
    %8 = vector.load %arg4[%c0_5, %c0_6] : memref<1x32xf32, #tpu.memory_space<vmem>>, vector<1x32xf32>
    %9 = vector.broadcast %8 : vector<1x32xf32> to vector<256x32xf32>
    %10 = arith.addf %7, %9 : vector<256x32xf32>
    %cst_7 = arith.constant 0.000000e+00 : f32
    %11 = vector.broadcast %cst_7 : f32 to vector<256x32xf32>
    %12 = arith.maximumf %10, %11 : vector<256x32xf32>
    %13 = arith.truncf %12 : vector<256x32xf32> to vector<256x32xbf16>
    %c0_8 = arith.constant 0 : index
    %c0_9 = arith.constant 0 : index
    %14 = vector.load %arg5[%c0_8, %c0_9] : memref<32x128xbf16, #tpu.memory_space<vmem>>, vector<32x128xbf16>
    %cst_10 = arith.constant dense<0.000000e+00> : vector<256x128xf32>
    %15 = tpu.matmul %13, %14, %cst_10 {dimension_numbers = #tpu.dot_dimension_numbers<[1], [0], [0], [1], [0, 0, 1, 1], [], []>} : vector<256x32xbf16>, vector<32x128xbf16>, vector<256x128xf32> -> vector<256x128xf32>
    %c0_11 = arith.constant 0 : index
    %c0_12 = arith.constant 0 : index
    %16 = vector.load %arg2[%c0_11, %c0_12] : memref<256x1xf32, #tpu.memory_space<vmem>>, vector<256x1xf32>
    %17 = vector.broadcast %16 : vector<256x1xf32> to vector<256x128xf32>
    %18 = arith.mulf %15, %17 : vector<256x128xf32>
    %19 = arith.truncf %18 : vector<256x128xf32> to vector<256x128xbf16>
    %c0_13 = arith.constant 0 : index
    %c0_14 = arith.constant 0 : index
    %20 = vector.load %arg6[%c0_13, %c0_14] : memref<256x128xbf16, #tpu.memory_space<vmem>>, vector<256x128xbf16>
    tpu.vector_store %arg6[%c0_13, %c0_14], %19 {strides = array<i32>} : memref<256x128xbf16, #tpu.memory_space<vmem>>, vector<256x128xbf16>,
    return
  }
  func.func @transform_0(%arg0: i32) -> (i32, i32) {
    %c0_i32 = arith.constant 0 : i32
    %c0_i32_0 = arith.constant 0 : i32
    return %arg0, %c0_i32 : i32, i32
  }
  func.func @transform_1(%arg0: i32) -> (i32, i32) {
    %c0_i32 = arith.constant 0 : i32
    %c0_i32_0 = arith.constant 0 : i32
    return %arg0, %c0_i32 : i32, i32
  }
  func.func @transform_2(%arg0: i32) -> (i32, i32) {
    %c0_i32 = arith.constant 0 : i32
    %c0_i32_0 = arith.constant 0 : i32
    %c0_i32_1 = arith.constant 0 : i32
    return %c0_i32, %c0_i32_0 : i32, i32
  }
  func.func @transform_3(%arg0: i32) -> (i32, i32) {
    %c0_i32 = arith.constant 0 : i32
    %c0_i32_0 = arith.constant 0 : i32
    %c0_i32_1 = arith.constant 0 : i32
    return %c0_i32, %c0_i32_0 : i32, i32
  }
  func.func @transform_4(%arg0: i32) -> (i32, i32) {
    %c0_i32 = arith.constant 0 : i32
    %c0_i32_0 = arith.constant 0 : i32
    %c0_i32_1 = arith.constant 0 : i32
    return %c0_i32, %c0_i32_0 : i32, i32
  }
  func.func @transform_5(%arg0: i32) -> (i32, i32) {
    %c0_i32 = arith.constant 0 : i32
    %c0_i32_0 = arith.constant 0 : i32
    return %arg0, %c0_i32 : i32, i32
  }
}

</mosaic_0001>

<bundles_post_ra>
// kernel: tpu_custom_call.1
= control target key start
LH: loop header
LB: loop body
LE: loop exit
PB: predicated region body
PF: predicated region fallthrough
CT: control target
= control target key end

     0   :  { %10 = vsyncpa [#allocation3], 0  ;;  %s4496_s0 = inlined_call_operand.hbm [shape: s8[1024,1024], index: 0, kind: input, shape index: {}]   ;;  %s4497_s1 = inlined_call_operand.vmem [shape: f32[1024,1], index: 1, kind: input, shape index: {}]   ;;  %s4498_s2 = inlined_call_operand.vmem [shape: bf16[1024,32], index: 2, kind: input, shape index: {}]   ;;  %s4499_s3 = inlined_call_operand.vmem [shape: f32[1,32], index: 3, kind: input, shape index: {}]   ;;  %s4500_s4 = inlined_call_operand.vmem [shape: bf16[32,128], index: 4, kind: input, shape index: {}]   ;;  %s4501_s5 = inlined_call_operand.hbm [shape: bf16[1024,128], index: 5, kind: output, shape index: {}]  }
   0x1   :  { %12 = vsyncpa [#allocation3 + $0x1], 0 }
   0x2   :  { %13 = vsyncpa [#allocation4], 0 }
   0x3   :  { %15 = vsyncpa [#allocation4 + $0x1], 0  ;;  %s3475_s18 = smov 0   ;;  %s3477_s19 = smov 0  }
   0x4   :  { %s3479_s20 = smov 0   ;;  %s3481_s21 = smov 0  }
   0x5 LB: > { %s3496_s22 = sadd.s32 4294967295, %s3436_s21   ;;  %s2445_s23 = sadd.s32 4294967294, %s3436_s21   ;;  %s3436_s21 = sphi %s3481_s21, %s4550_s21   ;;  %s3432_s20 = sphi %s3479_s20, %s4549_s20   ;;  %s3428_s19 = sphi %s3477_s19, %s4548_s19   ;;  %s3424_s18 = sphi %s3475_s18, %s4547_s18  }
   0x6   : > { %s3500_s24 = sadd.s32 1, %s3436_s21   ;;  %s28_s25 = sadd.s32 1, %s3432_s20 }
   0x7   : > { %s25_s26 = ssub.s32 %s3436_s21, %s3500_s24  ;;  %p35_p0 = scmp.ne.s32.totalorder %s3432_s20, %s3428_s19 }
   0x8   : > { %p26_p1 = scmp.eq.s32.totalorder %s25_s26, 0  ;;  %p36_p2 = scmp.eq.s32.totalorder %s3436_s21, 0 }
   0x9   : > { %p41_p3 = scmp.ne.s32.totalorder %s3428_s19, %s3424_s18  ;;  %p42_p4 = scmp.eq.s32.totalorder %s3496_s22, 0 }
   0xa   : > { %s3512_s27 = scalar_select %p26_p1, %s3432_s20, %s28_s25  }
   0xb   : > { %p3514_p5 = por %p36_p2, %p35_p0  ;;  %p3518_p6 = por %p42_p4, %p41_p3 }
   0xc   : > { %p154_p7 = scmp.eq.s32.totalorder %s3496_s22, 3  ;;  %p160_p8 = scmp.eq.s32.totalorder %s2445_s23, 3 }
   0xd   : > { %s4506_s29 = scalar_select %p3518_p6, 1, 0 }
   0xe   : > { %p3237_p9 = scmp.lt.s32.totalorder %s3436_s21, 4  ;;  %p3524_p10 = por %p154_p7, %p35_p0 }
   0xf   : > { %p3528_p11 = por %p160_p8, %p41_p3  ;;  %s189_s7 = sand.u32 1, %s3432_s20  }
  0x10   : > { %s4507_s30 = scalar_select %p3524_p10, 1, 0 }
  0x11   : > { %s4508_s6 = scalar_select %p3528_p11, 1, 0 }
  0x12   : > { %s2578_s8 = sshll.u32 %s3436_s21, 13  ;;  %s2448_s9 = sshll.u32 %s189_s7, 9 }
  0x13   : > { %s3537_s12 = scalar_lea.hbm %s4496_s0, %s2578_s8  ;;  %s193_s13 = scalar_lea.vmem [#allocation2], %s2448_s9 }
  0x14   : > { %s201_s14 = sshll.u32 %s193_s13, 4  ;;  %p3541_p12 = pnand %p3237_p9, %p3514_p5  ;;  %s3545_s14 = int_to_ptr.vmem [resolvable:$true] %s201_s14 }
  0x15   : > { %s3547_s16 = scalar_lea.sflag [#allocation3], %s189_s7  ;;  %s3344_s17 = scalar_lea.hbm %s3537_s12, 8192 }
  0x16   : > { %p3345_p13 = scmp.ne.s32.totalorder %s3537_s12, %s3344_s17  ;;  %p3346_p0 = pneg %p3541_p12 }
  0x17   : > { %s3349_s26 = scalar_lea.hbm %s4496_s0, 32768  ;;  %p3350_p3 = scmp.lt.s32.totalorder %s3537_s12, %s4496_s0 }
  0x18   : > { %p3347_p1 = pnand %p3346_p0, %p3345_p13  ;;  %p3351_p4 = scmp.lt.s32.totalorder %s3349_s26, %s3344_s17 }
  0x1a   : > { %p3348_p2 = pneg %p3347_p1  ;;  %p3352_p5 = por %p3351_p4, %p3350_p3 }
  0x1c   : > { %p3353_p7 = pnand %p3352_p5, %p3348_p2 }
  0x1e   : > { %3356 = shalt.err (!%p3353_p7)
}
  0x1f   : > { %s3357_s7 = scalar_lea.vmem %s3545_s14, 8192  ;;  %s3438_s9 = smov [#allocation2]  }
  0x20   : > { %p3358_p8 = scmp.ne.s32.totalorder %s3545_s14, %s3357_s7  ;;  %s3362_s10 = sshll.u32 %s3438_s9, 4  ;;  %s3363_s10 = int_to_ptr.vmem [resolvable:$false] %s3362_s10 }
  0x21   : > { %s3364_s11 = scalar_lea.vmem %s3363_s10, 16384  ;;  %p3365_p1 = scmp.lt.s32.totalorder %s3545_s14, %s3363_s10 }
  0x22   : > { %p3360_p9 = pnand %p3358_p8, %p3346_p0  ;;  %p3366_p11 = scmp.lt.s32.totalorder %s3364_s11, %s3357_s7 }
  0x24   : > { %p3361_p13 = pneg %p3360_p9  ;;  %p3367_p10 = por %p3366_p11, %p3365_p1 }
  0x26   : > { %p3368_p6 = pnand %p3367_p10, %p3361_p13 }
  0x28   : > { %3371 = shalt.err (!%p3368_p6)
}
  0x29   : > { %s3439_s13 = smov 1024   ;;  %s3440_s17 = smov 64  }
  0x2a   : > { %3232 = dma.hbm_to_vmem [thread:$0]  (!%p3541_p12), %s3537_s12, 8192, %s3545_s14, %s3547_s16, %s3439_s13, %s3439_s13, %s3440_s17  }
  0x2b   : > { %p2452_p0 = scmp.ge.s32.totalorder %s3436_s21, 1  ;;  %p218_p2 = scmp.lt.s32.totalorder %s3436_s21, 5 }
  0x2d   : > { %p219_p3 = pnand %p2452_p0, %p218_p2 }
  0x2f   : > { %222 = sbr.rel (%p219_p3) target bundleno = 797 (0x31d), region = 40 }
  0x34   : > { %s3571_s23 = sand.u32 1, %s3428_s19   ;;  %p4510_p6 = scmp.ne.s32.totalorder %s4506_s29, 0 }
  0x35   : > { %s2453_s25 = sshll.u32 %s3571_s23, 9  ;;  %s225_s26 = scalar_lea.sflag [#allocation3], %s3571_s23 }
  0x36   : > { %s3575_s28 = scalar_lea.vmem [#allocation2], %s2453_s25 }
  0x37   : > { %3415 = dma.done.wait (%p4510_p6), %s225_s26, 8192  }
  0x38   : > { %3417 = vsyncadd (%p4510_p6), %s225_s26, 4294959104  ;;  %v3278_v0 = vld [vmem:[%s4498_s2 + $0x78] sm:$0xff]   ;;  %v3280_v2 = vld [vmem:[%s4498_s2 + $0x70] sm:$0xff]   ;;  %s2455_s15 = sshll.u32 %s3496_s22, 5  ;;  %vm1944_vm0 = vcmask 261120   ;;  %s2454_s25 = sshll.u32 %s3571_s23, 7 }
  0x39   : > { %v3279_v1 = vld [vmem:[%s4498_s2 + $0x38] sm:$0xff]   ;;  %2707 = vmatprep.subr.bf16.mxu0 %v3278_v0  ;;  %3209 = vmatprep.subr.bf16.mxu1 %v3278_v0  ;;  %v3281_v3 = vld [vmem:[%s4498_s2 + $0x30] sm:$0xff]   ;;  %v3282_v4 = vld [vmem:[%s4498_s2 + $0x68] sm:$0xff]   ;;  %p262_p10 = scmp.lt.s32.totalorder %s2455_s15, 127  ;;  %s4401_s26 = scalar_lea.vmem [#allocation5], %s2454_s25 }
  0x3a   : > { %2708 = vmatpush3.bf16.msra.mxu0 %v3279_v1  ;;  %3217 = vmatpush3.bf16.msra.mxu1 %v3279_v1  ;;  %v3283_v5 = vld [vmem:[%s4498_s2 + $0x28] sm:$0xff]   ;;  %v3284_v6 = vld [vmem:[%s4498_s2 + $0x60] sm:$0xff]   ;;  %v3286_v8 = vld [vmem:[%s4498_s2 + $0x58] sm:$0xff]   ;;  %s2611_s12 = sshll.u32 %s3496_s22, 11  ;;  %s2360_s14 = sshll.u32 %s4401_s26, 4  ;;  %s4452_s14 = int_to_ptr.vmem [resolvable:$true] %s2360_s14 }
  0x3b   : > { %2709 = vmatprep.subr.bf16.mxu0 %v3280_v2  ;;  %3210 = vmatprep.subr.bf16.mxu1 %v3280_v2  ;;  %v3285_v7 = vld [vmem:[%s4498_s2 + $0x20] sm:$0xff]   ;;  %v3287_v9 = vld [vmem:[%s4498_s2 + $0x18] sm:$0xff]   ;;  %v3288_v10 = vld [vmem:[%s4498_s2 + $0x50] sm:$0xff]   ;;  %s4552_s15 = smov (!%p262_p10, %s2455_s15), 127  ;;  %s4450_s8 = scalar_lea.hbm %s4501_s5, %s2611_s12 }
  0x3c   : > { %v270_v11 = vld [vmem:[%s3575_s28 + $0x8] sm:$0xff]  ;;  %v3289_v15 = vld [vmem:[%s4498_s2 + $0x10] sm:$0xff]   ;;  %v3292_v18 = vld [vmem:[%s4498_s2 + $0x40] sm:$0xff]   ;;  %s2456_s16 = sshll.u32 %s4552_s15, 3  ;;  %s2347_s22 = scalar_lea.sflag [#allocation4], %s3571_s23 }
  0x3d   : > { %v318_v12 = vld [vmem:[%s3575_s28 + $0x188] sm:$0xff]  ;;  %v334_v13 = vunpack.c.l.s8.bf16 %v270_v11  ;;  %v3293_v19 = vld [vmem:[%s4498_s2] sm:$0xff]   ;;  %v3294_v22 = vld [vmem:[%s4498_s2 + $0xf8] sm:$0xff]   ;;  %v342_v25 = vunpack.c.h.s8.bf16 %v270_v11  ;;  %s3809_s9 = scalar_lea.vmem %s4497_s1, %s2456_s16  ;;  %s3372_s7 = scalar_lea.vmem %s4452_s14, 2048 }
  0x3e   : > { %2710 = vmatpush3.bf16.msra.mxu0 %v3281_v3  ;;  %3218 = vmatpush3.bf16.msra.mxu1 %v3281_v3  ;;  %v430_v14 = vunpack.c.l.s8.bf16 %v318_v12  ;;  %v3290_v16 = vld [vmem:[%s4498_s2 + $0x48] sm:$0xff]   ;;  %v269_v20 = vld [vmem:[%s3575_s28] sm:$0xff]  ;;  %v3295_v26 = vld [vmem:[%s4498_s2 + $0xb8] sm:$0xff]   ;;  %v438_v27 = vunpack.c.h.s8.bf16 %v318_v12  ;;  %p3373_p11 = scmp.ne.s32.totalorder %s4452_s14, %s3372_s7  ;;  %p4545_p12 = scmp.ne.s32.totalorder %s4507_s30, 0 }
  0x3f   : > { %2711 = vmatprep.subr.bf16.mxu0 %v3282_v4  ;;  %3211 = vmatprep.subr.bf16.mxu1 %v3282_v4  ;;  %v3291_v17 = vld [vmem:[%s4498_s2 + $0x8] sm:$0xff]   ;;  %v317_v21 = vld [vmem:[%s3575_s28 + $0x180] sm:$0xff]  ;;  %v333_v23 = vunpack.c.l.s8.bf16 %v269_v20  ;;  %v3296_v28 = vld [vmem:[%s4498_s2 + $0xf0] sm:$0xff]   ;;  %v341_v33 = vunpack.c.h.s8.bf16 %v269_v20 }
  0x40   : > { %1005 = vmatprep.mubr.bf16.mxu0 %v334_v13  ;;  %1101 = vmatprep.mubr.bf16.mxu1 %v430_v14  ;;  %v429_v24 = vunpack.c.l.s8.bf16 %v317_v21  ;;  %v3297_v29 = vld [vmem:[%s4498_s2 + $0xb0] sm:$0xff]   ;;  %v3298_v30 = vld [vmem:[%s4498_s2 + $0xe8] sm:$0xff]   ;;  %v437_v34 = vunpack.c.h.s8.bf16 %v317_v21  ;;  %v3300_v37 = vld [vmem:[%s4498_s2 + $0xe0] sm:$0xff]   ;;  %p3374_p4 = pnand %p3373_p11, %p4545_p12 }
  0x41   : > { %v278_v31 = vld [vmem:[%s3575_s28 + $0x48] sm:$0xff]  ;;  %v3301_v39 = vld [vmem:[%s4498_s2 + $0xa0] sm:$0xff]   ;;  %v3314_v42 = vld [vmem:[%s4498_s2 + $0x178] sm:$0xff]  }
  0x42   : > { %2712 = vmatpush3.bf16.msra.mxu0 %v3283_v5  ;;  %3219 = vmatpush3.bf16.msra.mxu1 %v3283_v5  ;;  %v326_v32 = vld [vmem:[%s3575_s28 + $0x1c8] sm:$0xff]  ;;  %v350_v36 = vunpack.c.l.s8.bf16 %v278_v31  ;;  %v277_v40 = vld [vmem:[%s3575_s28 + $0x40] sm:$0xff]  ;;  %v3315_v43 = vld [vmem:[%s4498_s2 + $0x138] sm:$0xff]   ;;  %v358_v48 = vunpack.c.h.s8.bf16 %v278_v31  ;;  %p3375_p5 = pneg %p3374_p4 }
  0x43   : > { %2713 = vmatprep.subr.bf16.mxu0 %v3284_v6  ;;  %3212 = vmatprep.subr.bf16.mxu1 %v3284_v6  ;;  %v3299_v35 = vld [vmem:[%s4498_s2 + $0xa8] sm:$0xff]   ;;  %v446_v38 = vunpack.c.l.s8.bf16 %v326_v32  ;;  %v325_v41 = vld [vmem:[%s3575_s28 + $0x1c0] sm:$0xff]  ;;  %v3302_v44 = vld [vmem:[%s4498_s2 + $0xd8] sm:$0xff]   ;;  %v349_v45 = vunpack.c.l.s8.bf16 %v277_v40  ;;  %v454_v51 = vunpack.c.h.s8.bf16 %v326_v32  ;;  %v357_v59 = vunpack.c.h.s8.bf16 %v277_v40 }
  0x44   : > { %v445_v46 = vunpack.c.l.s8.bf16 %v325_v41  ;;  %v3303_v47 = vld [vmem:[%s4498_s2 + $0x98] sm:$0xff]   ;;  %v3318_v49 = vld [vmem:[%s4498_s2 + $0x170] sm:$0xff]   ;;  %v3320_v53 = vld [vmem:[%s4498_s2 + $0x168] sm:$0xff]   ;;  %v453_v60 = vunpack.c.h.s8.bf16 %v325_v41 }
  0x45   : > { %v3304_v50 = vld [vmem:[%s4498_s2 + $0xd0] sm:$0xff]   ;;  %v3306_v55 = vld [vmem:[%s4498_s2 + $0xc8] sm:$0xff]   ;;  %v272_v57 = vld [vmem:[%s3575_s28 + $0x18] sm:$0xff] }
  0x46   : > { %2714 = vmatpush3.bf16.msra.mxu0 %v3285_v7  ;;  %3220 = vmatpush3.bf16.msra.mxu1 %v3285_v7  ;;  %v3319_v52 = vld [vmem:[%s4498_s2 + $0x130] sm:$0xff]   ;;  %v286_v56 = vld [vmem:[%s3575_s28 + $0x88] sm:$0xff]  ;;  %v3308_v63 = vld [vmem:[%s4498_s2 + $0xc0] sm:$0xff]   ;;  %v336_v0 = vunpack.c.l.s8.bf16 %v272_v57  ;;  %v344_v12 = vunpack.c.h.s8.bf16 %v272_v57 }
  0x47   : > { %2715 = vmatprep.subr.bf16.mxu0 %v3286_v8  ;;  %3213 = vmatprep.subr.bf16.mxu1 %v3286_v8  ;;  %v3305_v54 = vld [vmem:[%s4498_s2 + $0x90] sm:$0xff]   ;;  %v3321_v58 = vld [vmem:[%s4498_s2 + $0x128] sm:$0xff]   ;;  %v366_v62 = vunpack.c.l.s8.bf16 %v286_v56  ;;  %v3309_v1 = vld [vmem:[%s4498_s2 + $0x80] sm:$0xff]   ;;  %v374_v11 = vunpack.c.h.s8.bf16 %v286_v56 }
  0x48   : > { %v3307_v61 = vld [vmem:[%s4498_s2 + $0x88] sm:$0xff]   ;;  %v285_v2 = vld [vmem:[%s3575_s28 + $0x80] sm:$0xff]  ;;  %v271_v3 = vld [vmem:[%s3575_s28 + $0x10] sm:$0xff] }
  0x49   : > { %v3322_v4 = vld [vmem:[%s4498_s2 + $0x160] sm:$0xff]   ;;  %v3324_v6 = vld [vmem:[%s4498_s2 + $0x158] sm:$0xff]   ;;  %v365_v8 = vunpack.c.l.s8.bf16 %v285_v2  ;;  %v3312_v13 = vld [vmem:[%s4498_s2 + $0x1f0] sm:$0xff]   ;;  %v373_v21 = vunpack.c.h.s8.bf16 %v285_v2 }
  0x4a   : > { %2716 = vmatpush3.bf16.msra.mxu0 %v3287_v9  ;;  %3221 = vmatpush3.bf16.msra.mxu1 %v3287_v9  ;;  %v3323_v5 = vld [vmem:[%s4498_s2 + $0x120] sm:$0xff]   ;;  %v3310_v7 = vld [vmem:[%s4498_s2 + $0x1f8] sm:$0xff]   ;;  %v335_v9 = vunpack.c.l.s8.bf16 %v271_v3  ;;  %v3329_v20 = vld [vmem:[%s4498_s2 + $0x110] sm:$0xff]  }
  0x4b   : > { %2717 = vmatprep.subr.bf16.mxu0 %v3288_v10  ;;  %3214 = vmatprep.subr.bf16.mxu1 %v3288_v10  ;;  %v3311_v10 = vld [vmem:[%s4498_s2 + $0x1b8] sm:$0xff]   ;;  %v279_v31 = vld [vmem:[%s3575_s28 + $0x50] sm:$0xff]  ;;  %v3327_v32 = vld [vmem:[%s4498_s2 + $0x1a0] sm:$0xff]  }
  0x4c   : > { %v3326_v14 = vld [vmem:[%s4498_s2 + $0x118] sm:$0xff]   ;;  %v3336_v40 = vld [vmem:[%s4498_s2 + $0x1d0] sm:$0xff]   ;;  %v302_v41 = vld [vmem:[%s3575_s28 + $0x108] sm:$0xff] }
  0x4d   : > { %v406_v56 = vunpack.c.h.s8.bf16 %v302_v41 }
  0x4e   : > { %2718 = vmatpush3.bf16.msra.mxu0 %v3289_v15  ;;  %3222 = vmatpush3.bf16.msra.mxu1 %v3289_v15  ;;  %v3328_v15 = vld [vmem:[%s4498_s2 + $0x150] sm:$0xff]  }
  0x4f   : > { %2719 = vmatprep.subr.bf16.mxu0 %v3290_v16  ;;  %3215 = vmatprep.subr.bf16.mxu1 %v3290_v16  ;;  %v294_v16 = vld [vmem:[%s3575_s28 + $0xc8] sm:$0xff] }
  0x52   : > { %2720 = vmatpush3.bf16.msra.mxu0 %v3291_v17  ;;  %3223 = vmatpush3.bf16.msra.mxu1 %v3291_v17  ;;  %v3313_v17 = vld [vmem:[%s4498_s2 + $0x1b0] sm:$0xff]  }
  0x53   : > { %2721 = vmatprep.subr.bf16.mxu0 %v3292_v18  ;;  %3216 = vmatprep.subr.bf16.mxu1 %v3292_v18  ;;  %v280_v18 = vld [vmem:[%s3575_s28 + $0x58] sm:$0xff] }
  0x56   : > { %2722 = vmatpush3.bf16.msra.mxu0 %v3293_v19  ;;  %3224 = vmatpush3.bf16.msra.mxu1 %v3293_v19  ;;  %v3316_v19 = vld [vmem:[%s4498_s2 + $0x1e8] sm:$0xff]  }
  0x57   : > { %2819 = vmatprep.subr.bf16.mxu1 %v3294_v22  ;;  %2931 = vmatprep.subr.bf16.mxu0 %v3314_v42  ;;  %v343_v22 = vunpack.c.h.s8.bf16 %v271_v3  ;;  %v288_v42 = vld [vmem:[%s3575_s28 + $0x98] sm:$0xff] }
  0x58   : > { %v376_v57 = vunpack.c.h.s8.bf16 %v288_v42 }
  0x59   : > { %1006 = vmatmul.mubr.bf16.vlgmr.msra.gmra.mxu0 %v333_v23  ;;  %1102 = vmatmul.mubr.bf16.vlgmr.msra.gmra.mxu1 %v429_v24  ;;  %v382_v23 = vunpack.c.l.s8.bf16 %v294_v16  ;;  %v352_v24 = vunpack.c.l.s8.bf16 %v280_v18 }
  0x5a   : > { %2820 = vmatpush3.bf16.msra.mxu1 %v3295_v26  ;;  %1013 = vmatprep.mubr.bf16.mxu0 %v342_v25  ;;  %v3317_v25 = vld [vmem:[%s4498_s2 + $0x1a8] sm:$0xff]   ;;  %v3325_v26 = vld [vmem:[%s4498_s2 + $0x1e0] sm:$0xff]  }
  0x5b   : > { %2821 = vmatprep.subr.bf16.mxu1 %v3296_v28  ;;  %1109 = vmatprep.mubr.bf16.mxu1 %v438_v27  ;;  %v3330_v27 = vld [vmem:[%s4498_s2 + $0x148] sm:$0xff]  }
  0x5c   : > { %2932 = vmatpush3.bf16.msra.mxu0 %v3315_v43  ;;  %v3331_v28 = vld [vmem:[%s4498_s2 + $0x108] sm:$0xff]   ;;  %v3337_v43 = vld [vmem:[%s4498_s2 + $0x190] sm:$0xff]  }
  0x5d   : > { %2933 = vmatprep.subr.bf16.mxu0 %v3318_v49  ;;  %v3339_v49 = vld [vmem:[%s4498_s2 + $0x188] sm:$0xff]  }
  0x5e   : > { %2822 = vmatpush3.bf16.msra.mxu1 %v3297_v29  ;;  %v293_v29 = vld [vmem:[%s3575_s28 + $0xc0] sm:$0xff] }
  0x5f   : > { %2823 = vmatprep.subr.bf16.mxu1 %v3298_v30  ;;  %v3332_v30 = vld [vmem:[%s4498_s2 + $0x140] sm:$0xff]  }
  0x60   : > { %2934 = vmatpush3.bf16.msra.mxu0 %v3319_v52  ;;  %v287_v52 = vld [vmem:[%s3575_s28 + $0x90] sm:$0xff] }
  0x61   : > { %1014 = vmatmul.mubr.bf16.gmra.mxu0 %v341_v33  ;;  %1110 = vmatmul.mubr.bf16.gmra.mxu1 %v437_v34  ;;  %v3333_v33 = vld [vmem:[%s4498_s2 + $0x100] sm:$0xff]   ;;  %v3334_v34 = vld [vmem:[%s4498_s2 + $0x1d8] sm:$0xff]  }
  0x62   : > { %2824 = vmatpush3.bf16.msra.mxu1 %v3299_v35  ;;  %1021 = vmatprep.mubr.bf16.mxu0 %v350_v36  ;;  %v381_v35 = vunpack.c.l.s8.bf16 %v293_v29  ;;  %v351_v36 = vunpack.c.l.s8.bf16 %v279_v31 }
  0x63   : > { %2825 = vmatprep.subr.bf16.mxu1 %v3300_v37  ;;  %1117 = vmatprep.mubr.bf16.mxu1 %v446_v38  ;;  %v390_v37 = vunpack.c.h.s8.bf16 %v294_v16  ;;  %v360_v38 = vunpack.c.h.s8.bf16 %v280_v18  ;;  %v312_v18 = vld [vmem:[%s3575_s28 + $0x158] sm:$0xff] }
  0x64   : > { %2935 = vmatprep.subr.bf16.mxu0 %v3320_v53  ;;  %v3341_v53 = vld [vmem:[%s4498_s2 + $0x180] sm:$0xff]  }
  0x65   : > { %2936 = vmatpush3.bf16.msra.mxu0 %v3321_v58  ;;  %v310_v58 = vld [vmem:[%s3575_s28 + $0x148] sm:$0xff] }
  0x66   : > { %2826 = vmatpush3.bf16.msra.mxu1 %v3301_v39  ;;  %2937 = vmatprep.subr.bf16.mxu0 %v3322_v4  ;;  %v3335_v39 = vld [vmem:[%s4498_s2 + $0x198] sm:$0xff]   ;;  %v422_v4 = vunpack.c.h.s8.bf16 %v310_v58 }
  0x67   : > { %2827 = vmatprep.subr.bf16.mxu1 %v3302_v44  ;;  %v3338_v44 = vld [vmem:[%s4498_s2 + $0x1c8] sm:$0xff]  }
  0x69   : > { %1022 = vmatmul.mubr.bf16.gmra.mxu0 %v349_v45  ;;  %1118 = vmatmul.mubr.bf16.gmra.mxu1 %v445_v46  ;;  %v389_v45 = vunpack.c.h.s8.bf16 %v293_v29  ;;  %v359_v46 = vunpack.c.h.s8.bf16 %v279_v31 }
  0x6a   : > { %2828 = vmatpush3.bf16.msra.mxu1 %v3303_v47  ;;  %1029 = vmatprep.mubr.bf16.mxu0 %v358_v48  ;;  %v398_v47 = vunpack.c.l.s8.bf16 %v302_v41  ;;  %v368_v48 = vunpack.c.l.s8.bf16 %v288_v42  ;;  %v1621_v41 = vld [vmem:[%s3809_s9 + $0x20] sm:$0xff]  ;;  %v1622_v42 = vld [vmem:[%s3809_s9 + $0x28] sm:$0xff] }
  0x6b   : > { %2829 = vmatprep.subr.bf16.mxu1 %v3304_v50  ;;  %1125 = vmatprep.mubr.bf16.mxu1 %v454_v51  ;;  %v3340_v50 = vld [vmem:[%s4498_s2 + $0x1c0] sm:$0xff]  }
  0x6c   : > { %2938 = vmatpush3.bf16.msra.mxu0 %v3323_v5  ;;  %v301_v51 = vld [vmem:[%s3575_s28 + $0x100] sm:$0xff] }
  0x6d   : > { %2939 = vmatprep.subr.bf16.mxu0 %v3324_v6  ;;  %v304_v6 = vld [vmem:[%s3575_s28 + $0x118] sm:$0xff] }
  0x6e   : > { %2830 = vmatpush3.bf16.msra.mxu1 %v3305_v54  ;;  %v397_v54 = vunpack.c.l.s8.bf16 %v301_v51  ;;  %v408_v16 = vunpack.c.h.s8.bf16 %v304_v6 }
  0x6f   : > { %2831 = vmatprep.subr.bf16.mxu1 %v3306_v55  ;;  %v367_v55 = vunpack.c.l.s8.bf16 %v287_v52 }
  0x70   : > { %2940 = vmatpush3.bf16.msra.mxu0 %v3326_v14 }
  0x71   : > { %1030 = vmatmul.mubr.bf16.gmra.mxu0 %v357_v59  ;;  %1126 = vmatmul.mubr.bf16.gmra.mxu1 %v453_v60  ;;  %v296_v59 = vld [vmem:[%s3575_s28 + $0xd8] sm:$0xff]  ;;  %v405_v60 = vunpack.c.h.s8.bf16 %v301_v51  ;;  %v1625_v51 = vld [vmem:[%s3809_s9 + $0x40] sm:$0xff] }
  0x72   : > { %2832 = vmatpush3.bf16.msra.mxu1 %v3307_v61  ;;  %1037 = vmatprep.mubr.bf16.mxu0 %v366_v62  ;;  %v375_v61 = vunpack.c.h.s8.bf16 %v287_v52  ;;  %v414_v62 = vunpack.c.l.s8.bf16 %v310_v58  ;;  %v392_v5 = vunpack.c.h.s8.bf16 %v296_v59  ;;  %v1626_v52 = vld [vmem:[%s3809_s9 + $0x48] sm:$0xff] }
  0x73   : > { %2833 = vmatprep.subr.bf16.mxu1 %v3308_v63  ;;  %1166 = vmatprep.mubr.bf16.mxu1 %v336_v0  ;;  %v384_v63 = vunpack.c.l.s8.bf16 %v296_v59  ;;  %v309_v0 = vld [vmem:[%s3575_s28 + $0x140] sm:$0xff] }
  0x74   : > { %2941 = vmatprep.subr.bf16.mxu0 %v3328_v15  ;;  %v413_v2 = vunpack.c.l.s8.bf16 %v309_v0 }
  0x75   : > { %2942 = vmatpush3.bf16.msra.mxu0 %v3329_v20 }
  0x76   : > { %2834 = vmatpush3.bf16.msra.mxu1 %v3309_v1  ;;  %2943 = vmatprep.subr.bf16.mxu0 %v3330_v27  ;;  %v295_v1 = vld [vmem:[%s3575_s28 + $0xd0] sm:$0xff]  ;;  %v1617_v27 = vld [vmem:[%s3809_s9] sm:$0xff] }
  0x77   : > { %3043 = vmatprep.subr.bf16.mxu1 %v3310_v7  ;;  %v383_v3 = vunpack.c.l.s8.bf16 %v295_v1  ;;  %v274_v7 = vld [vmem:[%s3575_s28 + $0x28] sm:$0xff] }
  0x79   : > { %1038 = vmatmul.mubr.bf16.gmra.mxu0 %v365_v8  ;;  %1167 = vmatmul.mubr.bf16.vlgmr.msra.gmra.mxu1 %v335_v9  ;;  %v421_v8 = vunpack.c.h.s8.bf16 %v309_v0  ;;  %v391_v9 = vunpack.c.h.s8.bf16 %v295_v1  ;;  %v297_v0 = vld [vmem:[%s3575_s28 + $0xe0] sm:$0xff]  ;;  %v1631_v1 = vld [vmem:[%s3809_s9 + $0x70] sm:$0xff] }
  0x7a   : > { %3044 = vmatpush3.bf16.msra.mxu1 %v3311_v10  ;;  %1045 = vmatprep.mubr.bf16.mxu0 %v374_v11  ;;  %v400_v10 = vunpack.c.l.s8.bf16 %v304_v6  ;;  %v338_v11 = vunpack.c.l.s8.bf16 %v274_v7 }
  0x7b   : > { %1174 = vmatprep.mubr.bf16.mxu1 %v344_v12  ;;  %3045 = vmatprep.subr.bf16.mxu1 %v3312_v13  ;;  %v303_v12 = vld [vmem:[%s3575_s28 + $0x110] sm:$0xff]  ;;  %v273_v13 = vld [vmem:[%s3575_s28 + $0x20] sm:$0xff] }
  0x7c   : > { %2944 = vmatpush3.bf16.msra.mxu0 %v3331_v28  ;;  %v399_v14 = vunpack.c.l.s8.bf16 %v303_v12  ;;  %v337_v15 = vunpack.c.l.s8.bf16 %v273_v13  ;;  %v407_v20 = vunpack.c.h.s8.bf16 %v303_v12  ;;  %v1636_v12 = vld [vmem:[%s3809_s9 + $0x98] sm:$0xff] }
  0x7d   : > { %2945 = vmatprep.subr.bf16.mxu0 %v3332_v30  ;;  %v424_v30 = vunpack.c.h.s8.bf16 %v312_v18 }
  0x7e   : > { %3046 = vmatpush3.bf16.msra.mxu1 %v3313_v17  ;;  %v346_v17 = vunpack.c.h.s8.bf16 %v274_v7  ;;  %v1633_v7 = vld [vmem:[%s3809_s9 + $0x80] sm:$0xff] }
  0x7f   : > { %3047 = vmatprep.subr.bf16.mxu1 %v3316_v19  ;;  %v282_v19 = vld [vmem:[%s3575_s28 + $0x68] sm:$0xff] }
  0x80   : > { %2946 = vmatpush3.bf16.msra.mxu0 %v3333_v33  ;;  %v362_v31 = vunpack.c.h.s8.bf16 %v282_v19  ;;  %v1619_v33 = vld [vmem:[%s3809_s9 + $0x10] sm:$0xff] }
  0x81   : > { %1046 = vmatmul.mubr.bf16.gmra.mxu0 %v373_v21  ;;  %1175 = vmatmul.mubr.bf16.gmra.mxu1 %v343_v22  ;;  %v345_v21 = vunpack.c.h.s8.bf16 %v273_v13  ;;  %v416_v22 = vunpack.c.l.s8.bf16 %v312_v18  ;;  %v1638_v18 = vld [vmem:[%s3809_s9 + $0xa8] sm:$0xff] }
  0x82   : > { %1053 = vmatprep.mubr.bf16.mxu0 %v382_v23  ;;  %1182 = vmatprep.mubr.bf16.mxu1 %v352_v24  ;;  %v354_v23 = vunpack.c.l.s8.bf16 %v282_v19  ;;  %v311_v24 = vld [vmem:[%s3575_s28 + $0x150] sm:$0xff]  ;;  %v305_v19 = vld [vmem:[%s3575_s28 + $0x120] sm:$0xff] }
  0x83   : > { %3048 = vmatpush3.bf16.msra.mxu1 %v3317_v25  ;;  %v281_v25 = vld [vmem:[%s3575_s28 + $0x60] sm:$0xff]  ;;  %v415_v28 = vunpack.c.l.s8.bf16 %v311_v24 }
  0x84   : > { %3049 = vmatprep.subr.bf16.mxu1 %v3325_v26  ;;  %v3441_v26 = vmov 0   ;;  %v353_v29 = vunpack.c.l.s8.bf16 %v281_v25 }
  0x85   : > { %3276 = vset.pattern.permute.xlu0 %v3441_v26  ;;  %3277 = vset.pattern.permute.xlu1 %v3441_v26 }
  0x86   : > { %1651 = vperm.xlu0 %3276, %v1617_v27   ;;  %1661 = vperm.xlu1 %3277, %v1619_v33   ;;  %v1641_v27 = vld [vmem:[%s3809_s9 + $0xc0] sm:$0xff]  ;;  %v409_v33 = vunpack.c.h.s8.bf16 %v305_v19 }
  0x87   : > { %3050 = vmatpush3.bf16.msra.mxu1 %v3327_v32  ;;  %v1618_v32 = vld [vmem:[%s3809_s9 + $0x8] sm:$0xff] }
  0x88   : > { %3051 = vmatprep.subr.bf16.mxu1 %v3334_v34  ;;  %v320_v34 = vld [vmem:[%s3575_s28 + $0x198] sm:$0xff] }
  0x89   : > { %1054 = vmatmul.mubr.bf16.gmra.mxu0 %v381_v35  ;;  %1183 = vmatmul.mubr.bf16.gmra.mxu1 %v351_v36  ;;  %v290_v35 = vld [vmem:[%s3575_s28 + $0xa8] sm:$0xff]  ;;  %v1620_v36 = vld [vmem:[%s3809_s9 + $0x18] sm:$0xff] }
  0x8a   : > { %1061 = vmatprep.mubr.bf16.mxu0 %v390_v37  ;;  %1190 = vmatprep.mubr.bf16.mxu1 %v360_v38  ;;  %v423_v37 = vunpack.c.h.s8.bf16 %v311_v24  ;;  %v361_v38 = vunpack.c.h.s8.bf16 %v281_v25 }
  0x8b   : > { %3052 = vmatpush3.bf16.msra.mxu1 %v3335_v39  ;;  %1656 = vperm.xlu0 %3276, %v1618_v32   ;;  %v432_v39 = vunpack.c.l.s8.bf16 %v320_v34  ;;  %v1644_v32 = vld [vmem:[%s3809_s9 + $0xd8] sm:$0xff] }
  0x8c   : > { %3053 = vmatprep.subr.bf16.mxu1 %v3336_v40  ;;  %1666 = vperm.xlu1 %3277, %v1620_v36   ;;  %v370_v40 = vunpack.c.l.s8.bf16 %v290_v35 }
  0x8f   : > { %3054 = vmatpush3.bf16.msra.mxu1 %v3337_v43  ;;  %1671 = vperm.xlu0 %3276, %v1621_v41   ;;  %v319_v43 = vld [vmem:[%s3575_s28 + $0x190] sm:$0xff] }
  0x90   : > { %3055 = vmatprep.subr.bf16.mxu1 %v3338_v44  ;;  %1676 = vperm.xlu1 %3277, %v1622_v42   ;;  %v289_v44 = vld [vmem:[%s3575_s28 + $0xa0] sm:$0xff]  ;;  %v1647_v41 = vld [vmem:[%s3809_s9 + $0xf0] sm:$0xff]  ;;  %v1648_v42 = vld [vmem:[%s3809_s9 + $0xf8] sm:$0xff] }
  0x91   : > { %1062 = vmatmul.mubr.bf16.gmra.mxu0 %v389_v45  ;;  %1191 = vmatmul.mubr.bf16.gmra.mxu1 %v359_v46  ;;  %v1623_v45 = vld [vmem:[%s3809_s9 + $0x30] sm:$0xff]  ;;  %v1624_v46 = vld [vmem:[%s3809_s9 + $0x38] sm:$0xff]  ;;  %v377_v58 = vunpack.c.h.s8.bf16 %v289_v44 }
  0x92   : > { %1069 = vmatprep.mubr.bf16.mxu0 %v398_v47  ;;  %1198 = vmatprep.mubr.bf16.mxu1 %v368_v48  ;;  %v431_v47 = vunpack.c.l.s8.bf16 %v319_v43  ;;  %v369_v48 = vunpack.c.l.s8.bf16 %v289_v44 }
  0x93   : > { %3056 = vmatpush3.bf16.msra.mxu1 %v3339_v49  ;;  %1681 = vperm.xlu0 %3276, %v1623_v45   ;;  %v440_v49 = vunpack.c.h.s8.bf16 %v320_v34 }
  0x94   : > { %3057 = vmatprep.subr.bf16.mxu1 %v3340_v50  ;;  %1686 = vperm.xlu1 %3277, %v1624_v46   ;;  %v378_v50 = vunpack.c.h.s8.bf16 %v290_v35 }
  0x97   : > { %3058 = vmatpush3.bf16.msra.mxu1 %v3341_v53  ;;  %1691 = vperm.xlu0 %3276, %v1625_v51   ;;  %v1627_v53 = vld [vmem:[%s3809_s9 + $0x50] sm:$0xff] }
  0x98   : > { %1696 = vperm.xlu1 %3277, %v1626_v52  }
  0x99   : > { %1070 = vmatmul.mubr.bf16.gmra.mxu0 %v397_v54  ;;  %1199 = vmatmul.mubr.bf16.gmra.mxu1 %v367_v55  ;;  %v328_v54 = vld [vmem:[%s3575_s28 + $0x1d8] sm:$0xff]  ;;  %v298_v55 = vld [vmem:[%s3575_s28 + $0xe8] sm:$0xff] }
  0x9a   : > { %1077 = vmatprep.mubr.bf16.mxu0 %v406_v56  ;;  %1206 = vmatprep.mubr.bf16.mxu1 %v376_v57  ;;  %v1628_v56 = vld [vmem:[%s3809_s9 + $0x58] sm:$0xff]  ;;  %v439_v57 = vunpack.c.h.s8.bf16 %v319_v43  ;;  %v448_v59 = vunpack.c.l.s8.bf16 %v328_v54  ;;  %v394_v6 = vunpack.c.h.s8.bf16 %v298_v55 }
  0x9b   : > { %1701 = vperm.xlu0 %3276, %v1627_v53   ;;  %v3342_v53 = vld [vmem:[%s4500_s4 + $0x8] sm:$0xff]  }
  0x9c   : > { %1706 = vperm.xlu1 %3277, %v1628_v56   ;;  %3173 = vmatprep.subr.bf16.mxu0 %v3342_v53 }
  0xa1   : > { %1078 = vmatmul.mubr.bf16.gmra.mxu0 %v405_v60  ;;  %1207 = vmatmul.mubr.bf16.gmra.mxu1 %v375_v61  ;;  %v386_v60 = vunpack.c.l.s8.bf16 %v298_v55  ;;  %v1629_v61 = vld [vmem:[%s3809_s9 + $0x60] sm:$0xff]  ;;  %v291_v55 = vld [vmem:[%s3575_s28 + $0xb0] sm:$0xff] }
  0xa2   : > { %1085 = vmatprep.mubr.bf16.mxu0 %v414_v62  ;;  %1214 = vmatprep.mubr.bf16.mxu1 %v384_v63  ;;  %v1630_v62 = vld [vmem:[%s3809_s9 + $0x68] sm:$0xff]  ;;  %v327_v63 = vld [vmem:[%s3575_s28 + $0x1d0] sm:$0xff] }
  0xa3   : > { %1711 = vperm.xlu0 %3276, %v1629_v61   ;;  %1716 = vperm.xlu1 %3277, %v1630_v62   ;;  %v455_v13 = vunpack.c.h.s8.bf16 %v327_v63 }
  0xa7   : > { %1721 = vperm.xlu0 %3276, %v1631_v1   ;;  %v300_v1 = vld [vmem:[%s3575_s28 + $0xf8] sm:$0xff] }
  0xa9   : > { %1086 = vmatmul.mubr.bf16.gmra.mxu0 %v413_v2  ;;  %1215 = vmatmul.mubr.bf16.gmra.mxu1 %v383_v3  ;;  %v1632_v2 = vld [vmem:[%s3809_s9 + $0x78] sm:$0xff]  ;;  %v447_v3 = vunpack.c.l.s8.bf16 %v327_v63 }
  0xaa   : > { %1093 = vmatprep.mubr.bf16.mxu0 %v422_v4  ;;  %1222 = vmatprep.mubr.bf16.mxu1 %v392_v5  ;;  %v385_v4 = vunpack.c.l.s8.bf16 %v297_v0  ;;  %v456_v5 = vunpack.c.h.s8.bf16 %v328_v54  ;;  %v321_v54 = vld [vmem:[%s3575_s28 + $0x1a0] sm:$0xff] }
  0xab   : > { %1726 = vperm.xlu1 %3277, %v1632_v2   ;;  %1731 = vperm.xlu0 %3276, %v1633_v7   ;;  %v433_v56 = vunpack.c.l.s8.bf16 %v321_v54  ;;  %v379_v7 = vunpack.c.h.s8.bf16 %v291_v55 }
  0xb1   : > { %1094 = vmatmul.mubr.bf16.gmra.mxu0 %v421_v8  ;;  %1223 = vmatmul.mubr.bf16.gmra.mxu1 %v391_v9  ;;  %v1634_v8 = vld [vmem:[%s3809_s9 + $0x88] sm:$0xff]  ;;  %v1635_v9 = vld [vmem:[%s3809_s9 + $0x90] sm:$0xff] }
  0xb2   : > { %1230 = vmatprep.mubr.bf16.mxu1 %v400_v10  ;;  %1327 = vmatprep.mubr.bf16.mxu0 %v338_v11  ;;  %v306_v10 = vld [vmem:[%s3575_s28 + $0x128] sm:$0xff]  ;;  %v276_v11 = vld [vmem:[%s3575_s28 + $0x38] sm:$0xff] }
  0xb3   : > { %1736 = vperm.xlu1 %3277, %v1634_v8   ;;  %1741 = vperm.xlu0 %3276, %v1635_v9   ;;  %v410_v25 = vunpack.c.h.s8.bf16 %v306_v10  ;;  %v348_v26 = vunpack.c.h.s8.bf16 %v276_v11  ;;  %v388_v9 = vunpack.c.l.s8.bf16 %v300_v1 }
  0xb7   : > { %1746 = vperm.xlu1 %3277, %v1636_v12  }
  0xb9   : > { %1231 = vmatmul.mubr.bf16.gmra.mxu1 %v399_v14  ;;  %1328 = vmatmul.mubr.bf16.vlgmr.msra.gmra.mxu0 %v337_v15  ;;  %v393_v14 = vunpack.c.h.s8.bf16 %v297_v0  ;;  %v402_v15 = vunpack.c.l.s8.bf16 %v306_v10  ;;  %v330_v0 = vld [vmem:[%s3575_s28 + $0x1e8] sm:$0xff] }
  0xba   : > { %1238 = vmatprep.mubr.bf16.mxu1 %v408_v16  ;;  %1335 = vmatprep.mubr.bf16.mxu0 %v346_v17  ;;  %v340_v16 = vunpack.c.l.s8.bf16 %v276_v11  ;;  %v1637_v17 = vld [vmem:[%s3809_s9 + $0xa0] sm:$0xff]  ;;  %v450_v8 = vunpack.c.l.s8.bf16 %v330_v0 }
  0xbb   : > { %1751 = vperm.xlu0 %3276, %v1637_v17   ;;  %1756 = vperm.xlu1 %3277, %v1638_v18  }
  0xbc   : > { %3174 = vmatpush3.bf16.msra.mxu0 %v3342_v53 }
  0xc1   : > { %1239 = vmatmul.mubr.bf16.gmra.mxu1 %v407_v20  ;;  %1336 = vmatmul.mubr.bf16.gmra.mxu0 %v345_v21  ;;  %v275_v20 = vld [vmem:[%s3575_s28 + $0x30] sm:$0xff] }
  0xc2   : > { %1246 = vmatprep.mubr.bf16.mxu1 %v416_v22  ;;  %1343 = vmatprep.mubr.bf16.mxu0 %v354_v23  ;;  %v1639_v21 = vld [vmem:[%s3809_s9 + $0xb0] sm:$0xff]  ;;  %v1640_v22 = vld [vmem:[%s3809_s9 + $0xb8] sm:$0xff]  ;;  %v401_v23 = vunpack.c.l.s8.bf16 %v305_v19  ;;  %v339_v24 = vunpack.c.l.s8.bf16 %v275_v20  ;;  %v347_v34 = vunpack.c.h.s8.bf16 %v275_v20 }
  0xc3   : > { %1761 = vperm.xlu0 %3276, %v1639_v21   ;;  %1766 = vperm.xlu1 %3277, %v1640_v22  }
  0xc7   : > { %1771 = vperm.xlu0 %3276, %v1641_v27  }
  0xc9   : > { %1247 = vmatmul.mubr.bf16.gmra.mxu1 %v415_v28  ;;  %1344 = vmatmul.mubr.bf16.gmra.mxu0 %v353_v29  ;;  %v1642_v28 = vld [vmem:[%s3809_s9 + $0xc8] sm:$0xff]  ;;  %v1643_v29 = vld [vmem:[%s3809_s9 + $0xd0] sm:$0xff] }
  0xca   : > { %1254 = vmatprep.mubr.bf16.mxu1 %v424_v30  ;;  %1351 = vmatprep.mubr.bf16.mxu0 %v362_v31  ;;  %v314_v30 = vld [vmem:[%s3575_s28 + $0x168] sm:$0xff]  ;;  %v284_v31 = vld [vmem:[%s3575_s28 + $0x78] sm:$0xff] }
  0xcb   : > { %1776 = vperm.xlu1 %3277, %v1642_v28   ;;  %1781 = vperm.xlu0 %3276, %v1643_v29   ;;  %v418_v35 = vunpack.c.l.s8.bf16 %v314_v30  ;;  %v356_v36 = vunpack.c.l.s8.bf16 %v284_v31  ;;  %v426_v45 = vunpack.c.h.s8.bf16 %v314_v30  ;;  %v364_v46 = vunpack.c.h.s8.bf16 %v284_v31 }
  0xcf   : > { %1786 = vperm.xlu1 %3277, %v1644_v32  }
  0xd1   : > { %1255 = vmatmul.mubr.bf16.gmra.mxu1 %v423_v37  ;;  %1352 = vmatmul.mubr.bf16.gmra.mxu0 %v361_v38  ;;  %v1645_v37 = vld [vmem:[%s3809_s9 + $0xe0] sm:$0xff]  ;;  %v1646_v38 = vld [vmem:[%s3809_s9 + $0xe8] sm:$0xff]  ;;  %s3442_s9 = smov [#allocation5]  }
  0xd2   : > { %1262 = vmatprep.mubr.bf16.mxu1 %v432_v39  ;;  %1359 = vmatprep.mubr.bf16.mxu0 %v370_v40  ;;  %v313_v39 = vld [vmem:[%s3575_s28 + $0x160] sm:$0xff]  ;;  %v283_v40 = vld [vmem:[%s3575_s28 + $0x70] sm:$0xff]  ;;  %s3376_s10 = sshll.u32 %s3442_s9, 4  ;;  %s3377_s10 = int_to_ptr.vmem [resolvable:$false] %s3376_s10 }
  0xd3   : > { %1791 = vperm.xlu0 %3276, %v1645_v37   ;;  %1796 = vperm.xlu1 %3277, %v1646_v38   ;;  %v417_v43 = vunpack.c.l.s8.bf16 %v313_v39  ;;  %v355_v44 = vunpack.c.l.s8.bf16 %v283_v40  ;;  %s3378_s29 = scalar_lea.vmem %s3377_s10, 4096  ;;  %p3379_p7 = scmp.lt.s32.totalorder %s4452_s14, %s3377_s10 }
  0xd4   : > { %p3380_p8 = scmp.lt.s32.totalorder %s3378_s29, %s3372_s7 }
  0xd6   : > { %p3381_p9 = por %p3380_p8, %p3379_p7 }
  0xd7   : > { %1801 = vperm.xlu0 %3276, %v1647_v41   ;;  %1806 = vperm.xlu1 %3277, %v1648_v42  }
  0xd8   : > { %p3382_p13 = pnand %p3381_p9, %p3375_p5 }
  0xd9   : > { %1263 = vmatmul.mubr.bf16.gmra.mxu1 %v431_v47  ;;  %1360 = vmatmul.mubr.bf16.gmra.mxu0 %v369_v48  ;;  %v322_v47 = vld [vmem:[%s3575_s28 + $0x1a8] sm:$0xff]  ;;  %v292_v48 = vld [vmem:[%s3575_s28 + $0xb8] sm:$0xff] }
  0xda   : > { %1270 = vmatprep.mubr.bf16.mxu1 %v440_v49  ;;  %1367 = vmatprep.mubr.bf16.mxu0 %v378_v50  ;;  %v425_v49 = vunpack.c.h.s8.bf16 %v313_v39  ;;  %v363_v50 = vunpack.c.h.s8.bf16 %v283_v40  ;;  %v434_v51 = vunpack.c.l.s8.bf16 %v322_v47  ;;  %v372_v52 = vunpack.c.l.s8.bf16 %v292_v48 }
  0xe1   : > { %1271 = vmatmul.mubr.bf16.gmra.mxu1 %v439_v57  ;;  %1368 = vmatmul.mubr.bf16.gmra.mxu0 %v377_v58  ;;  %v371_v57 = vunpack.c.l.s8.bf16 %v291_v55  ;;  %v442_v58 = vunpack.c.h.s8.bf16 %v322_v47  ;;  %v307_v47 = vld [vmem:[%s3575_s28 + $0x130] sm:$0xff] }
  0xe2   : > { %1278 = vmatprep.mubr.bf16.mxu1 %v448_v59  ;;  %1375 = vmatprep.mubr.bf16.mxu0 %v386_v60  ;;  %v380_v59 = vunpack.c.h.s8.bf16 %v292_v48 }
  0xe9   : > { %1279 = vmatmul.mubr.bf16.gmra.mxu1 %v447_v3  ;;  %1376 = vmatmul.mubr.bf16.gmra.mxu0 %v385_v4 }
  0xea   : > { %1286 = vmatprep.mubr.bf16.mxu1 %v456_v5  ;;  %1383 = vmatprep.mubr.bf16.mxu0 %v394_v6  ;;  %v441_v6 = vunpack.c.h.s8.bf16 %v321_v54  ;;  %v403_v54 = vunpack.c.l.s8.bf16 %v307_v47 }
  0xf1   : > { %1287 = vmatmul.mubr.bf16.gmra.mxu1 %v455_v13  ;;  %1384 = vmatmul.mubr.bf16.gmra.mxu0 %v393_v14 }
  0xf2   : > { %1391 = vmatprep.mubr.bf16.mxu0 %v402_v15  ;;  %1488 = vmatprep.mubr.bf16.mxu1 %v340_v16  ;;  %v329_v15 = vld [vmem:[%s3575_s28 + $0x1e0] sm:$0xff]  ;;  %v299_v16 = vld [vmem:[%s3575_s28 + $0xf0] sm:$0xff] }
  0xf3   : > { %v457_v39 = vunpack.c.h.s8.bf16 %v329_v15  ;;  %v395_v40 = vunpack.c.h.s8.bf16 %v299_v16 }
  0xf9   : > { %1392 = vmatmul.mubr.bf16.gmra.mxu0 %v401_v23  ;;  %1489 = vmatmul.mubr.bf16.vlgmr.msra.gmra.mxu1 %v339_v24  ;;  %v449_v23 = vunpack.c.l.s8.bf16 %v329_v15  ;;  %v387_v24 = vunpack.c.l.s8.bf16 %v299_v16 }
  0xfa   : > { %1399 = vmatprep.mubr.bf16.mxu0 %v410_v25  ;;  %1496 = vmatprep.mubr.bf16.mxu1 %v348_v26  ;;  %v458_v25 = vunpack.c.h.s8.bf16 %v330_v0  ;;  %v396_v26 = vunpack.c.h.s8.bf16 %v300_v1 }
 0x101   : > { %1400 = vmatmul.mubr.bf16.gmra.mxu0 %v409_v33  ;;  %1497 = vmatmul.mubr.bf16.gmra.mxu1 %v347_v34  ;;  %v308_v34 = vld [vmem:[%s3575_s28 + $0x138] sm:$0xff] }
 0x102   : > { %1407 = vmatprep.mubr.bf16.mxu0 %v418_v35  ;;  %1504 = vmatprep.mubr.bf16.mxu1 %v356_v36  ;;  %v404_v41 = vunpack.c.l.s8.bf16 %v308_v34  ;;  %v412_v55 = vunpack.c.h.s8.bf16 %v308_v34 }
 0x109   : > { %1408 = vmatmul.mubr.bf16.gmra.mxu0 %v417_v43  ;;  %1505 = vmatmul.mubr.bf16.gmra.mxu1 %v355_v44 }
 0x10a   : > { %1415 = vmatprep.mubr.bf16.mxu0 %v426_v45  ;;  %1512 = vmatprep.mubr.bf16.mxu1 %v364_v46 }
 0x111   : > { %1416 = vmatmul.mubr.bf16.gmra.mxu0 %v425_v49  ;;  %1513 = vmatmul.mubr.bf16.gmra.mxu1 %v363_v50 }
 0x112   : > { %1423 = vmatprep.mubr.bf16.mxu0 %v434_v51  ;;  %1520 = vmatprep.mubr.bf16.mxu1 %v372_v52 }
 0x119   : > { %v2723_v60 = vpop.f32.mrf.mxu0  ;;  %v2795_v61 = vpop.f32.mrf.mxu1  ;;  %1424 = vmatmul.mubr.bf16.gmra.mxu0 %v433_v56  ;;  %1521 = vmatmul.mubr.bf16.gmra.mxu1 %v371_v57 }
 0x11a   : > { %1431 = vmatprep.mubr.bf16.mxu0 %v442_v58  ;;  %1528 = vmatprep.mubr.bf16.mxu1 %v380_v59 }
 0x11b   : > { %v2724_v62 = vpop.f32.mrf.mxu0  ;;  %v2796_v63 = vpop.f32.mrf.mxu1 }
 0x11c   : > { %v3868_v2 = vadd.f32 %v2724_v62, %v2723_v60  ;;  %v3870_v3 = vadd.f32 %v2796_v63, %v2795_v61  ;;  %v316_v63 = vld [vmem:[%s3575_s28 + $0x178] sm:$0xff] }
 0x11d   : > { %v3872_v4 = vpop.f32.mrf.mxu0  ;;  %v2798_v5 = vpop.f32.mrf.mxu1 }
 0x11f   : > { %v3874_v10 = vpop.f32.mrf.mxu0  ;;  %v2799_v11 = vpop.f32.mrf.mxu1 }
 0x120   : > { %v3876_v12 = vadd.f32 %v2799_v11, %v2798_v5  ;;  %v420_v11 = vunpack.c.l.s8.bf16 %v316_v63 }
 0x121   : > { %v2729_v13 = vpop.f32.mrf.mxu0  ;;  %v2801_v14 = vpop.f32.mrf.mxu1  ;;  %1432 = vmatmul.mubr.bf16.gmra.mxu0 %v441_v6  ;;  %1529 = vmatmul.mubr.bf16.gmra.mxu1 %v379_v7  ;;  %v411_v7 = vunpack.c.h.s8.bf16 %v307_v47 }
 0x122   : > { %1439 = vmatprep.mubr.bf16.mxu0 %v450_v8  ;;  %1536 = vmatprep.mubr.bf16.mxu1 %v388_v9  ;;  %v2728_v8 = vadd.f32 %v3874_v10, %v3872_v4 }
 0x123   : > { %v2730_v17 = vpop.f32.mrf.mxu0  ;;  %v2802_v18 = vpop.f32.mrf.mxu1 }
 0x124   : > { %v3880_v19 = vadd.f32 %v2730_v17, %v2729_v13  ;;  %v3882_v20 = vadd.f32 %v2802_v18, %v2801_v14 }
 0x125   : > { %v3884_v21 = vpop.f32.mrf.mxu0  ;;  %v2804_v22 = vpop.f32.mrf.mxu1 }
 0x127   : > { %v3886_v27 = vpop.f32.mrf.mxu0  ;;  %v2805_v28 = vpop.f32.mrf.mxu1 }
 0x128   : > { %v3888_v29 = vadd.f32 %v2805_v28, %v2804_v22  ;;  %v315_v22 = vld [vmem:[%s3575_s28 + $0x170] sm:$0xff]  ;;  %v2734_v28 = vadd.f32 %v3886_v27, %v3884_v21 }
 0x129   : > { %v2735_v30 = vpop.f32.mrf.mxu0  ;;  %v2807_v31 = vpop.f32.mrf.mxu1  ;;  %1440 = vmatmul.mubr.bf16.gmra.mxu0 %v449_v23  ;;  %1537 = vmatmul.mubr.bf16.gmra.mxu1 %v387_v24  ;;  %v427_v47 = vunpack.c.h.s8.bf16 %v315_v22 }
 0x12a   : > { %1447 = vmatprep.mubr.bf16.mxu0 %v458_v25  ;;  %1544 = vmatprep.mubr.bf16.mxu1 %v396_v26  ;;  %v419_v26 = vunpack.c.l.s8.bf16 %v315_v22 }
 0x12b   : > { %v2736_v32 = vpop.f32.mrf.mxu0  ;;  %v2808_v33 = vpop.f32.mrf.mxu1 }
 0x12c   : > { %v3891_v35 = vadd.f32 %v2736_v32, %v2735_v30  ;;  %v3893_v36 = vadd.f32 %v2808_v33, %v2807_v31  ;;  %v428_v31 = vunpack.c.h.s8.bf16 %v316_v63 }
 0x12d   : > { %v3895_v37 = vpop.f32.mrf.mxu0  ;;  %v2810_v38 = vpop.f32.mrf.mxu1 }
 0x12f   : > { %v3897_v42 = vpop.f32.mrf.mxu0  ;;  %v2811_v43 = vpop.f32.mrf.mxu1 }
 0x130   : > { %v3899_v44 = vadd.f32 %v2811_v43, %v2810_v38 }
 0x131   : > { %v2741_v45 = vpop.f32.mrf.mxu0  ;;  %v2813_v46 = vpop.f32.mrf.mxu1  ;;  %1448 = vmatmul.mubr.bf16.gmra.mxu0 %v457_v39  ;;  %1545 = vmatmul.mubr.bf16.gmra.mxu1 %v395_v40 }
 0x132   : > { %1552 = vmatprep.mubr.bf16.mxu1 %v404_v41 }
 0x133   : > { %v2742_v48 = vpop.f32.mrf.mxu0  ;;  %v2814_v49 = vpop.f32.mrf.mxu1 }
 0x134   : > { %v3902_v50 = vadd.f32 %v2742_v48, %v2741_v45  ;;  %v3904_v51 = vadd.f32 %v2814_v49, %v2813_v46  ;;  %v324_v45 = vld [vmem:[%s3575_s28 + $0x1b8] sm:$0xff]  ;;  %v2740_v48 = vadd.f32 %v3897_v42, %v3895_v37  ;;  %v323_v37 = vld [vmem:[%s3575_s28 + $0x1b0] sm:$0xff] }
 0x135   : > { %v3906_v52 = vpop.f32.mrf.mxu0  ;;  %v2816_v53 = vpop.f32.mrf.mxu1 }
 0x137   : > { %v3908_v56 = vpop.f32.mrf.mxu0  ;;  %v2817_v57 = vpop.f32.mrf.mxu1 }
 0x138   : > { %v3910_v58 = vadd.f32 %v2817_v57, %v2816_v53  ;;  %v436_v53 = vunpack.c.l.s8.bf16 %v324_v45 }
 0x139   : > { %v2747_v59 = vpop.f32.mrf.mxu0  ;;  %v2835_v60 = vpop.f32.mrf.mxu1  ;;  %1553 = vmatmul.mubr.bf16.gmra.mxu1 %v403_v54  ;;  %v3343_v54 = vld [vmem:[%s4500_s4] sm:$0xff]  }
 0x13a   : > { %1560 = vmatprep.mubr.bf16.mxu1 %v412_v55  ;;  %3175 = vmatprep.subr.bf16.mxu0 %v3343_v54 }
 0x13b   : > { %v2748_v61 = vpop.f32.mrf.mxu0  ;;  %v2836_v62 = vpop.f32.mrf.mxu1  ;;  %3176 = vmatpush3.bf16.msra.mxu0 %v3343_v54 }
 0x13c   : > { %v3913_v0 = vadd.f32 %v2748_v61, %v2747_v59  ;;  %v2837_v1 = vadd.f32 %v2836_v62, %v2835_v60 }
 0x13d   : > { %v3915_v5 = vpop.f32.mrf.mxu0  ;;  %v2838_v6 = vpop.f32.mrf.mxu1 }
 0x13e   : > { %v3920_v9 = vadd.f32 %v2837_v1, %v3868_v2 }
 0x13f   : > { %v3922_v13 = vpop.f32.mrf.mxu0  ;;  %v2839_v14 = vpop.f32.mrf.mxu1 }
 0x140   : > { %v2840_v15 = vadd.f32 %v2839_v14, %v2838_v6 }
 0x141   : > { %v2753_v16 = vpop.f32.mrf.mxu0  ;;  %v2841_v17 = vpop.f32.mrf.mxu1  ;;  %1561 = vmatmul.mubr.bf16.gmra.mxu1 %v411_v7 }
 0x142   : > { %v3924_v18 = vadd.f32 %v2840_v15, %v2728_v8  ;;  %1568 = vmatprep.mubr.bf16.mxu1 %v420_v11  ;;  %v435_v8 = vunpack.c.l.s8.bf16 %v323_v37  ;;  %v2746_v11 = vadd.f32 %v3908_v56, %v3906_v52  ;;  %v444_v15 = vunpack.c.h.s8.bf16 %v324_v45 }
 0x143   : > { %v2754_v23 = vpop.f32.mrf.mxu0  ;;  %v2842_v24 = vpop.f32.mrf.mxu1 }
 0x144   : > { %v3927_v25 = vadd.f32 %v2754_v23, %v2753_v16  ;;  %v2843_v4 = vadd.f32 %v2842_v24, %v2841_v17 }
 0x145   : > { %v3929_v10 = vpop.f32.mrf.mxu0  ;;  %v2844_v2 = vpop.f32.mrf.mxu1 }
 0x146   : > { %v3934_v30 = vadd.f32 %v2843_v4, %v3880_v19 }
 0x147   : > { %v3936_v32 = vpop.f32.mrf.mxu0  ;;  %v2845_v33 = vpop.f32.mrf.mxu1 }
 0x148   : > { %v2846_v34 = vadd.f32 %v2845_v33, %v2844_v2  ;;  %v443_v33 = vunpack.c.h.s8.bf16 %v323_v37 }
 0x149   : > { %v2759_v38 = vpop.f32.mrf.mxu0  ;;  %v2847_v39 = vpop.f32.mrf.mxu1  ;;  %1569 = vmatmul.mubr.bf16.gmra.mxu1 %v419_v26 }
 0x14a   : > { %v3938_v40 = vadd.f32 %v2846_v34, %v2734_v28  ;;  %1576 = vmatprep.mubr.bf16.mxu1 %v428_v31  ;;  %v332_v28 = vld [vmem:[%s3575_s28 + $0x1f8] sm:$0xff]  ;;  %v2752_v34 = vadd.f32 %v3922_v13, %v3915_v5 }
 0x14b   : > { %v2760_v41 = vpop.f32.mrf.mxu0  ;;  %v2848_v43 = vpop.f32.mrf.mxu1 }
 0x14c   : > { %v3941_v46 = vadd.f32 %v2760_v41, %v2759_v38  ;;  %v2849_v21 = vadd.f32 %v2848_v43, %v2847_v39  ;;  %v452_v39 = vunpack.c.l.s8.bf16 %v332_v28 }
 0x14d   : > { %v3943_v27 = vpop.f32.mrf.mxu0  ;;  %v2850_v19 = vpop.f32.mrf.mxu1 }
 0x14e   : > { %v3948_v49 = vadd.f32 %v2849_v21, %v3891_v35 }
 0x14f   : > { %v3953_v55 = vpop.f32.mrf.mxu0  ;;  %v2851_v57 = vpop.f32.mrf.mxu1 }
 0x150   : > { %v2852_v59 = vadd.f32 %v2851_v57, %v2850_v19 }
 0x151   : > { %v2765_v60 = vpop.f32.mrf.mxu0  ;;  %v2853_v61 = vpop.f32.mrf.mxu1  ;;  %1577 = vmatmul.mubr.bf16.gmra.mxu1 %v427_v47 }
 0x152   : > { %v3955_v62 = vadd.f32 %v2852_v59, %v2740_v48  ;;  %1584 = vmatprep.mubr.bf16.mxu1 %v436_v53  ;;  %v331_v53 = vld [vmem:[%s3575_s28 + $0x1f0] sm:$0xff] }
 0x153   : > { %v2766_v35 = vpop.f32.mrf.mxu0  ;;  %v2854_v42 = vpop.f32.mrf.mxu1 }
 0x154   : > { %v3958_v63 = vadd.f32 %v2766_v35, %v2765_v60  ;;  %v2855_v1 = vadd.f32 %v2854_v42, %v2853_v61  ;;  %v451_v60 = vunpack.c.l.s8.bf16 %v331_v53  ;;  %v2758_v61 = vadd.f32 %v3936_v32, %v3929_v10 }
 0x155   : > { %v3960_v6 = vpop.f32.mrf.mxu0  ;;  %v2856_v7 = vpop.f32.mrf.mxu1  ;;  %v460_v35 = vunpack.c.h.s8.bf16 %v332_v28  ;;  %v459_v32 = vunpack.c.h.s8.bf16 %v331_v53 }
 0x156   : > { %v3965_v14 = vadd.f32 %v2855_v1, %v3902_v50 }
 0x157   : > { %v3967_v16 = vpop.f32.mrf.mxu0  ;;  %v2857_v17 = vpop.f32.mrf.mxu1 }
 0x158   : > { %v2858_v22 = vadd.f32 %v2857_v17, %v2856_v7 }
 0x159   : > { %v2771_v23 = vpop.f32.mrf.mxu0  ;;  %v2859_v24 = vpop.f32.mrf.mxu1  ;;  %1585 = vmatmul.mubr.bf16.gmra.mxu1 %v435_v8 }
 0x15a   : > { %v3969_v4 = vadd.f32 %v2858_v22, %v2746_v11  ;;  %1592 = vmatprep.mubr.bf16.mxu1 %v444_v15 }
 0x15b   : > { %v2772_v2 = vpop.f32.mrf.mxu0  ;;  %v2860_v26 = vpop.f32.mrf.mxu1 }
 0x15c   : > { %v3972_v31 = vadd.f32 %v2772_v2, %v2771_v23  ;;  %v2861_v52 = vadd.f32 %v2860_v26, %v2859_v24 }
 0x15d   : > { %v2774_v50 = vpop.f32.mrf.mxu0  ;;  %v2862_v56 = vpop.f32.mrf.mxu1 }
 0x15e   : > { %v3977_v38 = vadd.f32 %v2861_v52, %v3913_v0 }
 0x15f   : > { %v2775_v41 = vpop.f32.mrf.mxu0  ;;  %v2863_v43 = vpop.f32.mrf.mxu1 }
 0x160   : > { %v3979_v45 = vadd.f32 %v2775_v41, %v2774_v50  ;;  %v2864_v21 = vadd.f32 %v2863_v43, %v2862_v56 }
 0x161   : > { %v2777_v19 = vpop.f32.mrf.mxu0  ;;  %v2865_v47 = vpop.f32.mrf.mxu1  ;;  %1593 = vmatmul.mubr.bf16.gmra.mxu1 %v443_v33 }
 0x162   : > { %v3981_v48 = vadd.f32 %v2864_v21, %v2752_v34  ;;  %1600 = vmatprep.mubr.bf16.mxu1 %v452_v39 }
 0x163   : > { %v2778_v54 = vpop.f32.mrf.mxu0  ;;  %v2866_v57 = vpop.f32.mrf.mxu1 }
 0x164   : > { %v3984_v59 = vadd.f32 %v2778_v54, %v2777_v19  ;;  %v2867_v5 = vadd.f32 %v2866_v57, %v2865_v47 }
 0x165   : > { %v2780_v0 = vpop.f32.mrf.mxu0  ;;  %v2868_v13 = vpop.f32.mrf.mxu1 }
 0x166   : > { %v3989_v37 = vadd.f32 %v2867_v5, %v3927_v25  ;;  %v2764_v25 = vadd.f32 %v3953_v55, %v3943_v27  ;;  %v2770_v27 = vadd.f32 %v3967_v16, %v3960_v6 }
 0x167   : > { %v2781_v42 = vpop.f32.mrf.mxu0  ;;  %v2869_v1 = vpop.f32.mrf.mxu1 }
 0x168   : > { %v2782_v7 = vadd.f32 %v2781_v42, %v2780_v0  ;;  %v2870_v8 = vadd.f32 %v2869_v1, %v2868_v13 }
 0x169   : > { %v2783_v11 = vpop.f32.mrf.mxu0  ;;  %v2871_v15 = vpop.f32.mrf.mxu1  ;;  %1601 = vmatmul.mubr.bf16.gmra.mxu1 %v451_v60 }
 0x16a   : > { %v3991_v17 = vadd.f32 %v2870_v8, %v2758_v61  ;;  %1608 = vmatprep.mubr.bf16.mxu1 %v460_v35 }
 0x16b   : > { %v2784_v22 = vpop.f32.mrf.mxu0  ;;  %v2872_v23 = vpop.f32.mrf.mxu1 }
 0x16c   : > { %v2785_v24 = vadd.f32 %v2784_v22, %v2783_v11  ;;  %v2873_v2 = vadd.f32 %v2872_v23, %v2871_v15 }
 0x16d   : > { %v2786_v26 = vpop.f32.mrf.mxu0  ;;  %v2874_v10 = vpop.f32.mrf.mxu1 }
 0x16e   : > { %v3996_v28 = vadd.f32 %v2873_v2, %v3941_v46 }
 0x16f   : > { %v2787_v52 = vpop.f32.mrf.mxu0  ;;  %v2875_v50 = vpop.f32.mrf.mxu1 }
 0x170   : > { %v2788_v56 = vadd.f32 %v2787_v52, %v2786_v26  ;;  %v2876_v33 = vadd.f32 %v2875_v50, %v2874_v10 }
 0x171   : > { %v2789_v34 = vpop.f32.mrf.mxu0  ;;  %v2877_v39 = vpop.f32.mrf.mxu1  ;;  %1609 = vmatmul.mubr.bf16.gmra.mxu1 %v459_v32 }
 0x172   : > { %v3998_v41 = vadd.f32 %v2876_v33, %v2764_v25 }
 0x173   : > { %v2790_v43 = vpop.f32.mrf.mxu0  ;;  %v2878_v21 = vpop.f32.mrf.mxu1 }
 0x174   : > { %v2791_v19 = vadd.f32 %v2790_v43, %v2789_v34  ;;  %v2879_v47 = vadd.f32 %v2878_v21, %v2877_v39 }
 0x175   : > { %v2792_v53 = vpop.f32.mrf.mxu0  ;;  %v2880_v54 = vpop.f32.mrf.mxu1 }
 0x176   : > { %v4003_v46 = vadd.f32 %v2879_v47, %v3958_v63 }
 0x177   : > { %v2793_v55 = vpop.f32.mrf.mxu0  ;;  %v2881_v57 = vpop.f32.mrf.mxu1 }
 0x178   : > { %v2794_v5 = vadd.f32 %v2793_v55, %v2792_v53  ;;  %v2882_v0 = vadd.f32 %v2881_v57, %v2880_v54 }
 0x179   : > { %v2883_v13 = vpop.f32.mrf.mxu1  ;;  %v4005_v60 = vpop.f32.mrf.mxu0 }
 0x17a   : > { %v4007_v61 = vadd.f32 %v2882_v0, %v2770_v27 }
 0x17b   : > { %v2884_v35 = vpop.f32.mrf.mxu1  ;;  %v4009_v42 = vpop.f32.mrf.mxu0 }
 0x17c   : > { %v2885_v1 = vadd.f32 %v2884_v35, %v2883_v13 }
 0x17d   : > { %v2886_v8 = vpop.f32.mrf.mxu1  ;;  %v4011_v11 = vpop.f32.mrf.mxu0 }
 0x17e   : > { %v4014_v6 = vadd.f32 %v2885_v1, %v3972_v31 }
 0x17f   : > { %v2887_v63 = vpop.f32.mrf.mxu1  ;;  %v4016_v16 = vpop.f32.mrf.mxu0 }
 0x180   : > { %4511 = vst [vmem:[#allocation8_spill] sm:$0xff] %v4014_v6  ;;  %v2888_v15 = vadd.f32 %v2887_v63, %v2886_v8 }
 0x181   : > { %v2889_v22 = vpop.f32.mrf.mxu1  ;;  %v4018_v23 = vpop.f32.mrf.mxu0 }
 0x182   : > { %v4021_v2 = vadd.f32 %v2888_v15, %v3979_v45 }
 0x183   : > { %v2890_v26 = vpop.f32.mrf.mxu1  ;;  %v4023_v10 = vpop.f32.mrf.mxu0 }
 0x184   : > { %4512 = vst [vmem:[#allocation9_spill] sm:$0xff] %v4021_v2  ;;  %v2891_v32 = vadd.f32 %v2890_v26, %v2889_v22 }
 0x185   : > { %v2892_v25 = vpop.f32.mrf.mxu1  ;;  %v4025_v52 = vpop.f32.mrf.mxu0 }
 0x186   : > { %v4028_v31 = vadd.f32 %v2891_v32, %v3984_v59 }
 0x187   : > { %v2893_v50 = vpop.f32.mrf.mxu1  ;;  %v4030_v33 = vpop.f32.mrf.mxu0 }
 0x188   : > { %4513 = vst [vmem:[#allocation10_spill] sm:$0xff] %v4028_v31  ;;  %v2894_v34 = vadd.f32 %v2893_v50, %v2892_v25 }
 0x189   : > { %v2895_v39 = vpop.f32.mrf.mxu1  ;;  %v4032_v43 = vpop.f32.mrf.mxu0 }
 0x18a   : > { %v4034_v21 = vadd.f32 %v2894_v34, %v2782_v7 }
 0x18b   : > { %v2896_v45 = vpop.f32.mrf.mxu1  ;;  %v4036_v47 = vpop.f32.mrf.mxu0 }
 0x18c   : > { %4514 = vst [vmem:[#allocation11_spill] sm:$0xff] %v4034_v21  ;;  %v2897_v53 = vadd.f32 %v2896_v45, %v2895_v39 }
 0x18d   : > { %v2898_v54 = vpop.f32.mrf.mxu1  ;;  %v4038_v27 = vpop.f32.mrf.mxu0 }
 0x18e   : > { %v4040_v55 = vadd.f32 %v2897_v53, %v2785_v24 }
 0x18f   : > { %v2899_v59 = vpop.f32.mrf.mxu1  ;;  %v4042_v57 = vpop.f32.mrf.mxu0 }
 0x190   : > { %4515 = vst [vmem:[#allocation12_spill] sm:$0xff] %v4040_v55  ;;  %v2900_v0 = vadd.f32 %v2899_v59, %v2898_v54 }
 0x191   : > { %v2901_v13 = vpop.f32.mrf.mxu1  ;;  %v4044_v35 = vpop.f32.mrf.mxu0 }
 0x192   : > { %v4046_v1 = vadd.f32 %v2900_v0, %v2788_v56 }
 0x193   : > { %v2902_v7 = vpop.f32.mrf.mxu1  ;;  %v4048_v8 = vpop.f32.mrf.mxu0 }
 0x194   : > { %4516 = vst [vmem:[#allocation13_spill] sm:$0xff] %v4046_v1  ;;  %v2903_v63 = vadd.f32 %v2902_v7, %v2901_v13 }
 0x195   : > { %v2904_v15 = vpop.f32.mrf.mxu1  ;;  %v4050_v22 = vpop.f32.mrf.mxu0 }
 0x196   : > { %v4052_v26 = vadd.f32 %v2903_v63, %v2791_v19 }
 0x197   : > { %v2905_v24 = vpop.f32.mrf.mxu1  ;;  %v4054_v32 = vpop.f32.mrf.mxu0 }
 0x198   : > { %4517 = vst [vmem:[#allocation14_spill] sm:$0xff] %v4052_v26  ;;  %v2906_v25 = vadd.f32 %v2905_v24, %v2904_v15 }
 0x199   : > { %v2907_v50 = vpop.f32.mrf.mxu1  ;;  %v4056_v34 = vpop.f32.mrf.mxu0 }
 0x19a   : > { %v4058_v39 = vadd.f32 %v2906_v25, %v2794_v5 }
 0x19b   : > { %v2908_v56 = vpop.f32.mrf.mxu1  ;;  %v4060_v45 = vpop.f32.mrf.mxu0 }
 0x19c   : > { %4518 = vst [vmem:[#allocation15_spill] sm:$0xff] %v4058_v39  ;;  %v2909_v53 = vadd.f32 %v2908_v56, %v2907_v50 }
 0x19d   : > { %v2910_v54 = vpop.f32.mrf.mxu1  ;;  %v4062_v59 = vpop.f32.mrf.mxu0 }
 0x19e   : > { %v4065_v0 = vadd.f32 %v2909_v53, %v3870_v3 }
 0x19f   : > { %v2911_v19 = vpop.f32.mrf.mxu1  ;;  %v4067_v13 = vpop.f32.mrf.mxu0 }
 0x1a0   : > { %4519 = vst [vmem:[#allocation16_spill] sm:$0xff] %v4065_v0  ;;  %v2912_v7 = vadd.f32 %v2911_v19, %v2910_v54 }
 0x1a1   : > { %v2913_v63 = vpop.f32.mrf.mxu1  ;;  %v4069_v15 = vpop.f32.mrf.mxu0 }
 0x1a2   : > { %v4072_v5 = vadd.f32 %v2912_v7, %v3876_v12 }
 0x1a3   : > { %v2914_v24 = vpop.f32.mrf.mxu1  ;;  %v4074_v25 = vpop.f32.mrf.mxu0 }
 0x1a4   : > { %4520 = vst [vmem:[#allocation17_spill] sm:$0xff] %v4072_v5  ;;  %v2915_v50 = vadd.f32 %v2914_v24, %v2913_v63 }
 0x1a5   : > { %v2916_v56 = vpop.f32.mrf.mxu1  ;;  %v4076_v39 = vpop.f32.mrf.mxu0 }
 0x1a6   : > { %v4079_v3 = vadd.f32 %v2915_v50, %v3882_v20 }
 0x1a7   : > { %v2917_v53 = vpop.f32.mrf.mxu1  ;;  %v4081_v0 = vpop.f32.mrf.mxu0 }
 0x1a8   : > { %4521 = vst [vmem:[#allocation18_spill] sm:$0xff] %v4079_v3  ;;  %v2918_v54 = vadd.f32 %v2917_v53, %v2916_v56 }
 0x1a9   : > { %v2919_v19 = vpop.f32.mrf.mxu1  ;;  %v4083_v26 = vpop.f32.mrf.mxu0 }
 0x1aa   : > { %v4086_v12 = vadd.f32 %v2918_v54, %v3888_v29 }
 0x1ab   : > { %v2920_v7 = vpop.f32.mrf.mxu1  ;;  %v4088_v5 = vpop.f32.mrf.mxu0 }
 0x1ac   : > { %4522 = vst [vmem:[#allocation19_spill] sm:$0xff] %v4086_v12  ;;  %v2921_v63 = vadd.f32 %v2920_v7, %v2919_v19 }
 0x1ad   : > { %v2922_v24 = vpop.f32.mrf.mxu1  ;;  %v4090_v1 = vpop.f32.mrf.mxu0 }
 0x1ae   : > { %v4093_v20 = vadd.f32 %v2921_v63, %v3893_v36 }
 0x1af   : > { %v2923_v50 = vpop.f32.mrf.mxu1  ;;  %v4095_v3 = vpop.f32.mrf.mxu0 }
 0x1b0   : > { %4523 = vst [vmem:[#allocation20_spill] sm:$0xff] %v4093_v20  ;;  %v2924_v56 = vadd.f32 %v2923_v50, %v2922_v24  ;;  %v2949_v24 = vadd.f32 %v4009_v42, %v4005_v60 }
 0x1b1   : > { %v2925_v53 = vpop.f32.mrf.mxu1  ;;  %v4097_v55 = vpop.f32.mrf.mxu0 }
 0x1b2   : > { %v4100_v29 = vadd.f32 %v2924_v56, %v3899_v44 }
 0x1b3   : > { %v2926_v54 = vpop.f32.mrf.mxu1  ;;  %v4102_v12 = vpop.f32.mrf.mxu0 }
 0x1b4   : > { %4524 = vst [vmem:[#allocation21_spill] sm:$0xff] %v4100_v29  ;;  %v2927_v19 = vadd.f32 %v2926_v54, %v2925_v53  ;;  %v4118_v53 = vpop.permute.xlu0 %1651 }
 0x1b5   : > { %v2928_v7 = vpop.f32.mrf.mxu1  ;;  %v4104_v21 = vpop.f32.mrf.mxu0 }
 0x1b6   : > { %v4107_v36 = vadd.f32 %v2927_v19, %v3904_v51  ;;  %v1330_v51 = vadd.f32 %v2949_v24, %v3920_v9  ;;  %v2952_v19 = vadd.f32 %v4016_v16, %v4011_v11  ;;  %v4136_v9 = vld [vmem:[%s4499_s3] ss:$0 sm:$0xff] }
 0x1b7   : > { %v2929_v63 = vpop.f32.mrf.mxu1  ;;  %v4109_v20 = vpop.f32.mrf.mxu0 }
 0x1b8   : > { %4525 = vst [vmem:[#allocation22_spill] sm:$0xff] %v4107_v36  ;;  %v2930_v50 = vadd.f32 %v2929_v63, %v2928_v7  ;;  %v1333_v63 = vadd.f32 %v2952_v19, %v3924_v18  ;;  %v4138_v16 = vpop.permute.xlu0 %1656  ;;  %v2958_v18 = vadd.f32 %v4030_v33, %v4025_v52  ;;  %v4147_v19 = vpop.permute.xlu1 %1661  ;;  %v2961_v52 = vadd.f32 %v4036_v47, %v4032_v43 }
 0x1b9   : > { %v4113_v31 = vpop.f32.mrf.mxu0  ;;  %v3059_v44 = vpop.f32.mrf.mxu1  ;;  %4527 = vst [vmem:[#allocation24_spill] sm:$0xff] %v4138_v16 }
 0x1ba   : > { %v4116_v56 = vadd.f32 %v2930_v50, %v3910_v58  ;;  %v2955_v58 = vadd.f32 %v4023_v10, %v4018_v23  ;;  %v1346_v43 = vadd.f32 %v2961_v52, %v3948_v49 }
 0x1bb   : > { %v4120_v54 = vpop.f32.mrf.mxu0  ;;  %v3060_v29 = vpop.f32.mrf.mxu1 }
 0x1bc   : > { %4526 = vst [vmem:[#allocation23_spill] sm:$0xff] %v4116_v56  ;;  %v3061_v36 = vadd.f32 %v3060_v29, %v3059_v44  ;;  %v1338_v23 = vadd.f32 %v2955_v58, %v3934_v30 }
 0x1bd   : > { %v4125_v2 = vpop.f32.mrf.mxu0  ;;  %v3062_v60 = vpop.f32.mrf.mxu1 }
 0x1be   : > { %v1491_v42 = vadd.f32 %v3061_v36, %v1330_v51 }
 0x1bf   : > { %v3063_v7 = vpop.f32.mrf.mxu1  ;;  %v4131_v56 = vpop.f32.mrf.mxu0 }
 0x1c0   : > { %v1809_v50 = vmul.f32 %v4118_v53, %v1491_v42  ;;  %v3064_v6 = vadd.f32 %v3063_v7, %v3062_v60 }
 0x1c1   : > { %v3065_v11 = vpop.f32.mrf.mxu1  ;;  %v4144_v24 = vpop.f32.mrf.mxu0 }
 0x1c2   : > { %v1494_v29 = vadd.f32 %v3064_v6, %v1333_v63  ;;  %v1848_v10 = vadd.f32 %v4136_v9, %v1809_v50  ;;  %v1341_v6 = vadd.f32 %v2958_v18, %v3938_v40 }
 0x1c3   : > { %v3066_v36 = vpop.f32.mrf.mxu1  ;;  %v4153_v58 = vpop.f32.mrf.mxu0 }
 0x1c4   : > { %v1810_v44 = vmul.f32 %v4138_v16, %v1494_v29  ;;  %v3067_v51 = vadd.f32 %v3066_v36, %v3065_v11  ;;  %v1880_v30 = vmax.f32 %v1848_v10, 0.0 }
 0x1c5   : > { %v3068_v60 = vpop.f32.mrf.mxu1  ;;  %v4162_v18 = vpop.f32.mrf.mxu0 }
 0x1c6   : > { %v1849_v42 = vadd.f32 %v4136_v9, %v1810_v44  ;;  %v1499_v7 = vadd.f32 %v3067_v51, %v1338_v23  ;;  %v2964_v23 = vadd.f32 %v4042_v57, %v4038_v27  ;;  %v4158_v44 = vpop.permute.xlu1 %1666  ;;  %v2967_v57 = vadd.f32 %v4048_v8, %v4044_v35 }
 0x1c7   : > { %v3069_v33 = vpop.f32.mrf.mxu1 }
 0x1c8   : > { %v1881_v63 = vmax.f32 %v1849_v42, 0.0  ;;  %v1811_v50 = vmul.f32 %v4147_v19, %v1499_v7  ;;  %v3070_v29 = vadd.f32 %v3069_v33, %v3068_v60  ;;  %v1349_v27 = vadd.f32 %v2964_v23, %v3955_v62  ;;  %v4172_v33 = vpop.f32.mrf.mxu0 }
 0x1c9   : > { %v3071_v11 = vpop.f32.mrf.mxu1  ;;  %v1354_v35 = vadd.f32 %v2967_v57, %v3965_v14 }
 0x1ca   : > { %v1912_v36 = vpack.c.bf16 %v1881_v63, %v1880_v30  ;;  %v1502_v16 = vadd.f32 %v3070_v29, %v1341_v6  ;;  %v1850_v47 = vadd.f32 %v4136_v9, %v1811_v50  ;;  %v4170_v6 = vpop.permute.xlu0 %1671  ;;  %v4177_v62 = vpop.permute.xlu1 %1676 }
 0x1cb   : > { %v3072_v40 = vpop.f32.mrf.mxu1  ;;  %v4180_v8 = vpop.f32.mrf.mxu0 }
 0x1cc   : > { %v1812_v10 = vmul.f32 %v4158_v44, %v1502_v16  ;;  %v3073_v51 = vadd.f32 %v3072_v40, %v3071_v11  ;;  %3177 = vmatprep.mubr.msk.bf16.mxu0 %vm1944_vm0, %v1912_v36  ;;  %v1882_v52 = vmax.f32 %v1850_v47, 0.0  ;;  %v2970_v36 = vadd.f32 %v4054_v32, %v4050_v22 }
 0x1cd   : > { %v3074_v60 = vpop.f32.mrf.mxu1  ;;  %v2973_v32 = vadd.f32 %v4060_v45, %v4056_v34 }
 0x1ce   : > { %v1851_v42 = vadd.f32 %v4136_v9, %v1812_v10  ;;  %v1507_v7 = vadd.f32 %v3073_v51, %v1346_v43  ;;  %v1357_v22 = vadd.f32 %v2970_v36, %v3969_v4  ;;  %v4196_v4 = vpop.permute.xlu1 %1686 }
 0x1cf   : > { %v3075_v49 = vpop.f32.mrf.mxu1  ;;  %v1362_v34 = vadd.f32 %v2973_v32, %v3977_v38 }
 0x1d0   : > { %v1883_v30 = vmax.f32 %v1851_v42, 0.0  ;;  %v1813_v16 = vmul.f32 %v4170_v6, %v1507_v7  ;;  %v3076_v63 = vadd.f32 %v3075_v49, %v3074_v60  ;;  %v4189_v42 = vpop.permute.xlu0 %1681  ;;  %v4191_v7 = vpop.f32.mrf.mxu0 }
 0x1d1   : > { %v3077_v50 = vpop.f32.mrf.mxu1 }
 0x1d2   : > { %v1913_v29 = vpack.c.bf16 %v1883_v30, %v1882_v52  ;;  %v1510_v11 = vadd.f32 %v3076_v63, %v1349_v27  ;;  %v1852_v40 = vadd.f32 %v4136_v9, %v1813_v16  ;;  %v4199_v45 = vpop.f32.mrf.mxu0 }
 0x1d3   : > { %v3078_v23 = vpop.f32.mrf.mxu1 }
 0x1d4   : > { %v1814_v43 = vmul.f32 %v4177_v62, %v1510_v11  ;;  %v3079_v47 = vadd.f32 %v3078_v23, %v3077_v50  ;;  %3178 = vmatmul.mubr.msk.bf16.vlgmr.msra.gmra.mxu0 %vm1944_vm0, %v1913_v29  ;;  %v1884_v27 = vmax.f32 %v1852_v40, 0.0  ;;  %v2976_v50 = vadd.f32 %v4067_v13, %v4062_v59 }
 0x1d5   : > { %v3080_v10 = vpop.f32.mrf.mxu1  ;;  %v2979_v13 = vadd.f32 %v4074_v25, %v4069_v15 }
 0x1d6   : > { %v1853_v51 = vadd.f32 %v4136_v9, %v1814_v43  ;;  %v1515_v60 = vadd.f32 %v3079_v47, %v1354_v35  ;;  %v1365_v59 = vadd.f32 %v2976_v50, %v3981_v48  ;;  %v4208_v47 = vpop.permute.xlu0 %1691  ;;  %v4215_v48 = vpop.permute.xlu1 %1696 }
 0x1d7   : > { %v3081_v14 = vpop.f32.mrf.mxu1  ;;  %v1370_v15 = vadd.f32 %v2979_v13, %v3989_v37 }
 0x1d8   : > { %v1885_v57 = vmax.f32 %v1853_v51, 0.0  ;;  %v1815_v49 = vmul.f32 %v4189_v42, %v1515_v60  ;;  %v3082_v52 = vadd.f32 %v3081_v14, %v3080_v10  ;;  %v4210_v10 = vpop.f32.mrf.mxu0 }
 0x1d9   : > { %v3083_v30 = vpop.f32.mrf.mxu1 }
 0x1da   : > { %v1518_v16 = vadd.f32 %v3082_v52, %v1357_v22  ;;  %v1914_v63 = vpack.c.bf16 %v1885_v57, %v1884_v27  ;;  %v1854_v11 = vadd.f32 %v4136_v9, %v1815_v49  ;;  %v2982_v49 = vadd.f32 %v4081_v0, %v4076_v39  ;;  %v4218_v25 = vpop.f32.mrf.mxu0 }
 0x1db   : > { %v3084_v29 = vpop.f32.mrf.mxu1  ;;  %v2985_v0 = vadd.f32 %v4088_v5, %v4083_v26 }
 0x1dc   : > { %v1816_v36 = vmul.f32 %v4196_v4, %v1518_v16  ;;  %v3085_v23 = vadd.f32 %v3084_v29, %v3083_v30  ;;  %3181 = vmatprep.mubr.msk.bf16.mxu0 %vm1944_vm0, %v1914_v63  ;;  %v1886_v51 = vmax.f32 %v1854_v11, 0.0  ;;  %v1373_v39 = vadd.f32 %v2982_v49, %v3991_v17  ;;  %v4227_v11 = vpop.permute.xlu0 %1701  ;;  %v4234_v17 = vpop.permute.xlu1 %1706 }
 0x1dd   : > { %v3086_v35 = vpop.f32.mrf.mxu1  ;;  %v1378_v26 = vadd.f32 %v2985_v0, %v3996_v28  ;;  %v2994_v0 = vadd.f32 %v4109_v20, %v4104_v21  ;;  %v2997_v20 = vadd.f32 %v4120_v54, %v4113_v31  ;;  %v4528_v31 = vld [vmem:[#allocation8_spill] sm:$0xff] }
 0x1de   : > { %v1855_v40 = vadd.f32 %v4136_v9, %v1816_v36  ;;  %v1523_v43 = vadd.f32 %v3085_v23, %v1362_v34  ;;  %v4229_v36 = vpop.f32.mrf.mxu0 }
 0x1df   : > { %v3087_v38 = vpop.f32.mrf.mxu1  ;;  %v1389_v21 = vadd.f32 %v2994_v0, %v4007_v61  ;;  %v1394_v54 = vadd.f32 %v2997_v20, %v4528_v31 }
 0x1e0   : > { %v1887_v60 = vmax.f32 %v1855_v40, 0.0  ;;  %v1817_v22 = vmul.f32 %v4208_v47, %v1523_v43  ;;  %v3088_v32 = vadd.f32 %v3087_v38, %v3086_v35  ;;  %v4237_v5 = vpop.f32.mrf.mxu0 }
 0x1e1   : > { %v3089_v14 = vpop.f32.mrf.mxu1 }
 0x1e2   : > { %v1915_v27 = vpack.c.bf16 %v1887_v60, %v1886_v51  ;;  %v1526_v57 = vadd.f32 %v3088_v32, %v1365_v59  ;;  %v1856_v30 = vadd.f32 %v4136_v9, %v1817_v22  ;;  %v2988_v51 = vadd.f32 %v4095_v3, %v4090_v1 }
 0x1e3   : > { %v3090_v52 = vpop.f32.mrf.mxu1  ;;  %v2991_v3 = vadd.f32 %v4102_v12, %v4097_v55 }
 0x1e4   : > { %v1818_v16 = vmul.f32 %v4215_v48, %v1526_v57  ;;  %v3091_v63 = vadd.f32 %v3090_v52, %v3089_v14  ;;  %3182 = vmatmul.mubr.msk.bf16.gmra.mxu0 %vm1944_vm0, %v1915_v27  ;;  %v1888_v23 = vmax.f32 %v1856_v30, 0.0  ;;  %v1381_v1 = vadd.f32 %v2988_v51, %v3998_v41  ;;  %v4246_v52 = vpop.permute.xlu0 %1711  ;;  %v4253_v41 = vpop.permute.xlu1 %1716 }
 0x1e5   : > { %v3092_v50 = vpop.f32.mrf.mxu1  ;;  %v1386_v55 = vadd.f32 %v2991_v3, %v4003_v46 }
 0x1e6   : > { %v1857_v29 = vadd.f32 %v4136_v9, %v1818_v16  ;;  %v1531_v34 = vadd.f32 %v3091_v63, %v1370_v15  ;;  %v4248_v15 = vpop.f32.mrf.mxu0 }
 0x1e7   : > { %v3093_v37 = vpop.f32.mrf.mxu1 }
 0x1e8   : > { %v1889_v35 = vmax.f32 %v1857_v29, 0.0  ;;  %v1819_v40 = vmul.f32 %v4227_v11, %v1531_v34  ;;  %v3094_v43 = vadd.f32 %v3093_v37, %v3092_v50  ;;  %v4256_v12 = vpop.f32.mrf.mxu0  ;;  %v4272_v61 = vpop.permute.xlu1 %1726 }
 0x1e9   : > { %v3095_v59 = vpop.f32.mrf.mxu1 }
 0x1ea   : > { %v1534_v13 = vadd.f32 %v3094_v43, %v1373_v39  ;;  %v1916_v38 = vpack.c.bf16 %v1889_v35, %v1888_v23  ;;  %v1858_v22 = vadd.f32 %v4136_v9, %v1819_v40  ;;  %v4267_v51 = vpop.f32.mrf.mxu0 }
 0x1eb   : > { %v3096_v60 = vpop.f32.mrf.mxu1 }
 0x1ec   : > { %v1820_v32 = vmul.f32 %v4234_v17, %v1534_v13  ;;  %v3097_v14 = vadd.f32 %v3096_v60, %v3095_v59  ;;  %3185 = vmatprep.mubr.msk.bf16.mxu0 %vm1944_vm0, %v1916_v38  ;;  %v1890_v30 = vmax.f32 %v1858_v22, 0.0  ;;  %v4265_v38 = vpop.permute.xlu0 %1721  ;;  %v4275_v3 = vpop.f32.mrf.mxu0 }
 0x1ed   : > { %v3098_v27 = vpop.f32.mrf.mxu1  ;;  %v4291_v20 = vpop.permute.xlu1 %1736 }
 0x1ee   : > { %v1859_v57 = vadd.f32 %v4136_v9, %v1820_v32  ;;  %v1539_v49 = vadd.f32 %v3097_v14, %v1378_v26 }
 0x1ef   : > { %v3099_v28 = vpop.f32.mrf.mxu1 }
 0x1f0   : > { %v1891_v16 = vmax.f32 %v1859_v57, 0.0  ;;  %v1821_v63 = vmul.f32 %v4246_v52, %v1539_v49  ;;  %v3100_v50 = vadd.f32 %v3099_v28, %v3098_v27  ;;  %v3000_v49 = vadd.f32 %v4131_v56, %v4125_v2 }
 0x1f1   : > { %v3101_v29 = vpop.f32.mrf.mxu1  ;;  %v3003_v56 = vadd.f32 %v4153_v58, %v4144_v24  ;;  %v4530_v24 = vld [vmem:[#allocation10_spill] sm:$0xff] }
 0x1f2   : > { %v1917_v34 = vpack.c.bf16 %v1891_v16, %v1890_v30  ;;  %v1542_v39 = vadd.f32 %v3100_v50, %v1381_v1  ;;  %v1860_v23 = vadd.f32 %v4136_v9, %v1821_v63 }
 0x1f3   : > { %v3102_v37 = vpop.f32.mrf.mxu1  ;;  %v1402_v58 = vadd.f32 %v3003_v56, %v4530_v24  ;;  %v4310_v56 = vpop.permute.xlu1 %1746 }
 0x1f4   : > { %v1822_v35 = vmul.f32 %v4253_v41, %v1542_v39  ;;  %v3103_v40 = vadd.f32 %v3102_v37, %v3101_v29  ;;  %3186 = vmatmul.mubr.msk.bf16.gmra.mxu0 %vm1944_vm0, %v1917_v34  ;;  %v1892_v60 = vmax.f32 %v1860_v23, 0.0  ;;  %v4529_v34 = vld [vmem:[#allocation9_spill] sm:$0xff]  ;;  %v4284_v39 = vpop.permute.xlu0 %1731  ;;  %v4286_v37 = vpop.f32.mrf.mxu0 }
 0x1f5   : > { %v3104_v43 = vpop.f32.mrf.mxu1  ;;  %v1397_v2 = vadd.f32 %v3000_v49, %v4529_v34  ;;  %v4531_v49 = vld [vmem:[#allocation11_spill] sm:$0xff] }
 0x1f6   : > { %v1861_v59 = vadd.f32 %v4136_v9, %v1822_v35  ;;  %v1547_v13 = vadd.f32 %v3103_v40, %v1386_v55 }
 0x1f7   : > { %v3105_v46 = vpop.f32.mrf.mxu1 }
 0x1f8   : > { %v1893_v26 = vmax.f32 %v1861_v59, 0.0  ;;  %v1823_v22 = vmul.f32 %v4265_v38, %v1547_v13  ;;  %v3106_v32 = vadd.f32 %v3105_v46, %v3104_v43 }
 0x1f9   : > { %v3107_v14 = vpop.f32.mrf.mxu1 }
 0x1fa   : > { %v1550_v27 = vadd.f32 %v3106_v32, %v1389_v21  ;;  %v1918_v57 = vpack.c.bf16 %v1893_v26, %v1892_v60  ;;  %v1862_v28 = vadd.f32 %v4136_v9, %v1823_v22  ;;  %v3006_v21 = vadd.f32 %v4172_v33, %v4162_v18  ;;  %v4294_v60 = vpop.f32.mrf.mxu0 }
 0x1fb   : > { %v3108_v1 = vpop.f32.mrf.mxu1  ;;  %v3009_v33 = vadd.f32 %v4191_v7, %v4180_v8  ;;  %v4532_v8 = vld [vmem:[#allocation12_spill] sm:$0xff] }
 0x1fc   : > { %v1824_v30 = vmul.f32 %v4272_v61, %v1550_v27  ;;  %v3109_v16 = vadd.f32 %v3108_v1, %v3107_v14  ;;  %3189 = vmatprep.mubr.msk.bf16.mxu0 %vm1944_vm0, %v1918_v57  ;;  %v1894_v55 = vmax.f32 %v1862_v28, 0.0  ;;  %v1405_v18 = vadd.f32 %v3006_v21, %v4531_v49  ;;  %v4303_v1 = vpop.permute.xlu0 %1741  ;;  %v4533_v21 = vld [vmem:[#allocation13_spill] sm:$0xff] }
 0x1fd   : > { %v3110_v63 = vpop.f32.mrf.mxu1  ;;  %v1410_v7 = vadd.f32 %v3009_v33, %v4532_v8  ;;  %v4327_v33 = vpop.permute.xlu1 %1756 }
 0x1fe   : > { %v1863_v50 = vadd.f32 %v4136_v9, %v1824_v30  ;;  %v1555_v29 = vadd.f32 %v3109_v16, %v1394_v54  ;;  %v4305_v54 = vpop.f32.mrf.mxu0 }
 0x1ff   : > { %v3111_v0 = vpop.f32.mrf.mxu1 }
 0x200   : > { %v1895_v23 = vmax.f32 %v1863_v50, 0.0  ;;  %v1825_v35 = vmul.f32 %v4284_v39, %v1555_v29  ;;  %v3112_v40 = vadd.f32 %v3111_v0, %v3110_v63 }
 0x201   : > { %v3113_v43 = vpop.f32.mrf.mxu1 }
 0x202   : > { %v1919_v59 = vpack.c.bf16 %v1895_v23, %v1894_v55  ;;  %v1558_v13 = vadd.f32 %v3112_v40, %v1397_v2  ;;  %v1864_v26 = vadd.f32 %v4136_v9, %v1825_v35  ;;  %v3012_v2 = vadd.f32 %v4210_v10, %v4199_v45  ;;  %v4313_v55 = vpop.f32.mrf.mxu0 }
 0x203   : > { %v3114_v46 = vpop.f32.mrf.mxu1  ;;  %v3015_v10 = vadd.f32 %v4229_v36, %v4218_v25 }
 0x204   : > { %v1826_v22 = vmul.f32 %v4291_v20, %v1558_v13  ;;  %v3115_v32 = vadd.f32 %v3114_v46, %v3113_v43  ;;  %3190 = vmatmul.mubr.msk.bf16.gmra.mxu0 %vm1944_vm0, %v1919_v59  ;;  %v1896_v28 = vmax.f32 %v1864_v26, 0.0  ;;  %v1413_v45 = vadd.f32 %v3012_v2, %v4533_v21  ;;  %v4322_v46 = vpop.permute.xlu0 %1751  ;;  %v4535_v2 = vld [vmem:[#allocation15_spill] sm:$0xff] }
 0x205   : > { %v3116_v14 = vpop.f32.mrf.mxu1 }
 0x206   : > { %v1865_v27 = vadd.f32 %v4136_v9, %v1826_v22  ;;  %v1563_v57 = vadd.f32 %v3115_v32, %v1402_v58  ;;  %v3029_v58 = vpop.f32.mrf.mxu0 }
 0x207   : > { %v3117_v31 = vpop.f32.mrf.mxu1 }
 0x208   : > { %v1897_v30 = vmax.f32 %v1865_v27, 0.0  ;;  %v1827_v16 = vmul.f32 %v4303_v1, %v1563_v57  ;;  %v3118_v63 = vadd.f32 %v3117_v31, %v3116_v14  ;;  %v3031_v36 = vpop.f32.mrf.mxu0 }
 0x209   : > { %v3119_v50 = vpop.f32.mrf.mxu1 }
 0x20a   : > { %v1566_v29 = vadd.f32 %v3118_v63, %v1405_v18  ;;  %v1920_v34 = vpack.c.bf16 %v1897_v30, %v1896_v28  ;;  %v1866_v23 = vadd.f32 %v4136_v9, %v1827_v16  ;;  %v3018_v18 = vadd.f32 %v4248_v15, %v4237_v5  ;;  %v4534_v28 = vld [vmem:[#allocation14_spill] sm:$0xff]  ;;  %v4337_v15 = vpop.permute.xlu0 %1761 }
 0x20b   : > { %v3120_v0 = vpop.f32.mrf.mxu1  ;;  %v1418_v25 = vadd.f32 %v3015_v10, %v4534_v28  ;;  %v3021_v5 = vadd.f32 %v4267_v51, %v4256_v12  ;;  %v4342_v10 = vpop.permute.xlu1 %1766 }
 0x20c   : > { %v1828_v35 = vmul.f32 %v4310_v56, %v1566_v29  ;;  %v3121_v40 = vadd.f32 %v3120_v0, %v3119_v50  ;;  %3193 = vmatprep.mubr.msk.bf16.mxu0 %vm1944_vm0, %v1920_v34  ;;  %v1898_v26 = vmax.f32 %v1866_v23, 0.0  ;;  %v1421_v0 = vadd.f32 %v3018_v18, %v4535_v2  ;;  %v4537_v18 = vld [vmem:[#allocation17_spill] sm:$0xff] }
 0x20d   : > { %v3122_v43 = vpop.f32.mrf.mxu1 }
 0x20e   : > { %v1867_v59 = vadd.f32 %v4136_v9, %v1828_v35  ;;  %v1571_v13 = vadd.f32 %v3121_v40, %v1410_v7  ;;  %v3032_v7 = vpop.f32.mrf.mxu0 }
 0x20f   : > { %v3123_v24 = vpop.f32.mrf.mxu1 }
 0x210   : > { %v1899_v22 = vmax.f32 %v1867_v59, 0.0  ;;  %v1829_v32 = vmul.f32 %v4322_v46, %v1571_v13  ;;  %v3124_v14 = vadd.f32 %v3123_v24, %v3122_v43  ;;  %v3034_v51 = vpop.f32.mrf.mxu0 }
 0x211   : > { %v3125_v27 = vpop.f32.mrf.mxu1 }
 0x212   : > { %v1921_v57 = vpack.c.bf16 %v1899_v22, %v1898_v26  ;;  %v1574_v49 = vadd.f32 %v3124_v14, %v1413_v45  ;;  %v1868_v30 = vadd.f32 %v4136_v9, %v1829_v32  ;;  %v3024_v45 = vadd.f32 %v4286_v37, %v4275_v3  ;;  %v4536_v26 = vld [vmem:[#allocation16_spill] sm:$0xff]  ;;  %v4352_v37 = vpop.permute.xlu0 %1771 }
 0x213   : > { %v3126_v31 = vpop.f32.mrf.mxu1  ;;  %v1426_v12 = vadd.f32 %v3021_v5, %v4536_v26  ;;  %v3027_v3 = vadd.f32 %v4305_v54, %v4294_v60  ;;  %v4356_v5 = vpop.permute.xlu1 %1776 }
 0x214   : > { %v1830_v16 = vmul.f32 %v4327_v33, %v1574_v49  ;;  %v3127_v63 = vadd.f32 %v3126_v31, %v3125_v27  ;;  %3194 = vmatmul.mubr.msk.bf16.gmra.mxu0 %vm1944_vm0, %v1921_v57  ;;  %v1900_v23 = vmax.f32 %v1868_v30, 0.0  ;;  %v1429_v31 = vadd.f32 %v3024_v45, %v4537_v18  ;;  %v4539_v45 = vld [vmem:[#allocation19_spill] sm:$0xff] }
 0x215   : > { %v3128_v50 = vpop.f32.mrf.mxu1 }
 0x216   : > { %v1869_v29 = vadd.f32 %v4136_v9, %v1830_v16  ;;  %v1579_v34 = vadd.f32 %v3127_v63, %v1418_v25  ;;  %v3035_v25 = vpop.f32.mrf.mxu0 }
 0x217   : > { %v3129_v8 = vpop.f32.mrf.mxu1 }
 0x218   : > { %v1901_v35 = vmax.f32 %v1869_v29, 0.0  ;;  %v1831_v40 = vmul.f32 %v4337_v15, %v1579_v34  ;;  %v3130_v43 = vadd.f32 %v3129_v8, %v3128_v50  ;;  %v3037_v60 = vpop.f32.mrf.mxu0 }
 0x219   : > { %v3131_v59 = vpop.f32.mrf.mxu1 }
 0x21a   : > { %v1582_v13 = vadd.f32 %v3130_v43, %v1421_v0  ;;  %v1922_v21 = vpack.c.bf16 %v1901_v35, %v1900_v23  ;;  %v1870_v22 = vadd.f32 %v4136_v9, %v1831_v40  ;;  %v3030_v0 = vadd.f32 %v3029_v58, %v4313_v55  ;;  %v4538_v23 = vld [vmem:[#allocation18_spill] sm:$0xff]  ;;  %v4364_v58 = vpop.permute.xlu0 %1781 }
 0x21b   : > { %v3132_v24 = vpop.f32.mrf.mxu1  ;;  %v1434_v35 = vadd.f32 %v3027_v3, %v4538_v23  ;;  %v3033_v55 = vadd.f32 %v3032_v7, %v3031_v36  ;;  %v4367_v3 = vpop.permute.xlu1 %1786 }
 0x21c   : > { %v1832_v32 = vmul.f32 %v4342_v10, %v1582_v13  ;;  %v3133_v14 = vadd.f32 %v3132_v24, %v3131_v59  ;;  %3197 = vmatprep.mubr.msk.bf16.mxu0 %vm1944_vm0, %v1922_v21  ;;  %v1902_v30 = vmax.f32 %v1870_v22, 0.0  ;;  %v1437_v24 = vadd.f32 %v3030_v0, %v4539_v45  ;;  %v4541_v0 = vld [vmem:[#allocation21_spill] sm:$0xff] }
 0x21d   : > { %v3134_v27 = vpop.f32.mrf.mxu1 }
 0x21e   : > { %v1871_v57 = vadd.f32 %v4136_v9, %v1832_v32  ;;  %v1587_v49 = vadd.f32 %v3133_v14, %v1426_v12  ;;  %v3038_v12 = vpop.f32.mrf.mxu0 }
 0x21f   : > { %v3135_v28 = vpop.f32.mrf.mxu1 }
 0x220   : > { %v1903_v16 = vmax.f32 %v1871_v57, 0.0  ;;  %v1833_v63 = vmul.f32 %v4352_v37, %v1587_v49  ;;  %v3136_v50 = vadd.f32 %v3135_v28, %v3134_v27 }
 0x221   : > { %v3137_v29 = vpop.f32.mrf.mxu1 }
 0x222   : > { %v1923_v34 = vpack.c.bf16 %v1903_v16, %v1902_v30  ;;  %v1590_v2 = vadd.f32 %v3136_v50, %v1429_v31  ;;  %v1872_v54 = vadd.f32 %v4136_v9, %v1833_v63  ;;  %v3036_v31 = vadd.f32 %v3035_v25, %v3034_v51  ;;  %v4540_v30 = vld [vmem:[#allocation20_spill] sm:$0xff]  ;;  %v3040_v63 = vpop.f32.mrf.mxu0  ;;  %v4375_v25 = vpop.permute.xlu0 %1791 }
 0x223   : > { %v3138_v8 = vpop.f32.mrf.mxu1  ;;  %v1442_v16 = vadd.f32 %v3033_v55, %v4540_v30  ;;  %v3039_v51 = vadd.f32 %v3038_v12, %v3037_v60  ;;  %v4378_v55 = vpop.permute.xlu1 %1796 }
 0x224   : > { %v1834_v40 = vmul.f32 %v4356_v5, %v1590_v2  ;;  %v3139_v43 = vadd.f32 %v3138_v8, %v3137_v29  ;;  %3198 = vmatmul.mubr.msk.bf16.gmra.mxu0 %vm1944_vm0, %v1923_v34  ;;  %v1904_v22 = vmax.f32 %v1872_v54, 0.0  ;;  %v1445_v8 = vadd.f32 %v3036_v31, %v4541_v0 }
 0x225   : > { %v3140_v59 = vpop.f32.mrf.mxu1 }
 0x226   : > { %v1873_v13 = vadd.f32 %v4136_v9, %v1834_v40  ;;  %v1595_v21 = vadd.f32 %v3139_v43, %v1434_v35  ;;  %v3041_v35 = vpop.f32.mrf.mxu0 }
 0x227   : > { %v3141_v26 = vpop.f32.mrf.mxu1 }
 0x228   : > { %v1905_v32 = vmax.f32 %v1873_v13, 0.0  ;;  %v1835_v14 = vmul.f32 %v4364_v58, %v1595_v21  ;;  %v3142_v27 = vadd.f32 %v3141_v26, %v3140_v59 }
 0x229   : > { %v3143_v57 = vpop.f32.mrf.mxu1 }
 0x22a   : > { %v1598_v49 = vadd.f32 %v3142_v27, %v1437_v24  ;;  %v1924_v18 = vpack.c.bf16 %v1905_v32, %v1904_v22  ;;  %v1874_v36 = vadd.f32 %v4136_v9, %v1835_v14  ;;  %v3042_v24 = vadd.f32 %v3041_v35, %v3040_v63  ;;  %v4542_v22 = vld [vmem:[#allocation22_spill] sm:$0xff] }
 0x22b   : > { %v3144_v28 = vpop.f32.mrf.mxu1  ;;  %v1450_v32 = vadd.f32 %v3039_v51, %v4542_v22 }
 0x22c   : > { %v1836_v7 = vmul.f32 %v4367_v3, %v1598_v49  ;;  %v3145_v50 = vadd.f32 %v3144_v28, %v3143_v57  ;;  %3201 = vmatprep.mubr.msk.bf16.mxu0 %vm1944_vm0, %v1924_v18  ;;  %v1906_v54 = vmax.f32 %v1874_v36, 0.0  ;;  %v4543_v18 = vld [vmem:[#allocation23_spill] sm:$0xff]  ;;  %v4386_v28 = vpop.permute.xlu0 %1801 }
 0x22d   : > { %v3146_v29 = vpop.f32.mrf.mxu1  ;;  %v1453_v31 = vadd.f32 %v3042_v24, %v4543_v18 }
 0x22e   : > { %v1875_v34 = vadd.f32 %v4136_v9, %v1836_v7  ;;  %v1603_v2 = vadd.f32 %v3145_v50, %v1442_v16 }
 0x22f   : > { %v3147_v23 = vpop.f32.mrf.mxu1 }
 0x230   : > { %v1907_v40 = vmax.f32 %v1875_v34, 0.0  ;;  %v1837_v43 = vmul.f32 %v4375_v25, %v1603_v2  ;;  %v3148_v59 = vadd.f32 %v3147_v23, %v3146_v29  ;;  %v4389_v34 = vpop.permute.xlu1 %1806 }
 0x231   : > { %v3149_v13 = vpop.f32.mrf.mxu1 }
 0x232   : > { %v1925_v21 = vpack.c.bf16 %v1907_v40, %v1906_v54  ;;  %v1606_v45 = vadd.f32 %v3148_v59, %v1445_v8  ;;  %v1876_v60 = vadd.f32 %v4136_v9, %v1837_v43 }
 0x233   : > { %v3150_v26 = vpop.f32.mrf.mxu1 }
 0x234   : > { %v1838_v12 = vmul.f32 %v4378_v55, %v1606_v45  ;;  %v3151_v14 = vadd.f32 %v3150_v26, %v3149_v13  ;;  %3202 = vmatmul.mubr.msk.bf16.gmra.mxu0 %vm1944_vm0, %v1925_v21  ;;  %v1908_v16 = vmax.f32 %v1876_v60, 0.0  ;;  %v4544_v26 = vld [vmem:[#allocation24_spill] sm:$0xff] }
 0x235   : > { %v3152_v27 = vpop.f32.mrf.mxu1 }
 0x236   : > { %v1877_v57 = vadd.f32 %v4136_v9, %v1838_v12  ;;  %v1611_v49 = vadd.f32 %v3151_v14, %v1450_v32 }
 0x237   : > { %v3153_v30 = vpop.f32.mrf.mxu1 }
 0x238   : > { %v1909_v63 = vmax.f32 %v1877_v57, 0.0  ;;  %v1839_v36 = vmul.f32 %v4386_v28, %v1611_v49  ;;  %v3154_v7 = vadd.f32 %v3153_v30, %v3152_v27 }
 0x23a   : > { %v1614_v50 = vadd.f32 %v3154_v7, %v1453_v31  ;;  %v1926_v29 = vpack.c.bf16 %v1909_v63, %v1908_v16  ;;  %v1878_v2 = vadd.f32 %v4136_v9, %v1839_v36 }
 0x23c   : > { %v1840_v0 = vmul.f32 %v4389_v34, %v1614_v50  ;;  %3205 = vmatprep.mubr.msk.bf16.mxu0 %vm1944_vm0, %v1926_v29  ;;  %v1910_v51 = vmax.f32 %v1878_v2, 0.0 }
 0x23e   : > { %v1879_v8 = vadd.f32 %v4136_v9, %v1840_v0 }
 0x240   : > { %v1911_v23 = vmax.f32 %v1879_v8, 0.0 }
 0x242   : > { %v1927_v35 = vpack.c.bf16 %v1911_v23, %v1910_v51 }
 0x244   : > { %3206 = vmatmul.mubr.msk.bf16.gmra.mxu0 %vm1944_vm0, %v1927_v35 }
 0x294   : > { %v3179_v54 = vpop.f32.mrf.mxu0 }
 0x295   : > { %v2156_v59 = vmul.f32 %v3179_v54, %v4147_v19 }
 0x296   : > { %v2027_v40 = vpop.f32.mrf.mxu0 }
 0x297   : > { %v2154_v45 = vmul.f32 %v2027_v40, %v4118_v53 }
 0x298   : > { %v3180_v43 = vpop.f32.mrf.mxu0 }
 0x299   : > { %v2157_v13 = vmul.f32 %v3180_v43, %v4158_v44 }
 0x29a   : > { %v2030_v21 = vpop.f32.mrf.mxu0 }
 0x29b   : > { %v2620_v24 = vpack.c.bf16 %v2157_v13, %v2156_v59  ;;  %v2155_v22 = vmul.f32 %v2030_v21, %v4544_v26 }
 0x29d   : > { %2692 = vst [vmem:[%s4401_s26 + $0x8] sm:$0xff] %v2620_v24   ;;  %v2615_v9 = vpack.c.bf16 %v2155_v22, %v2154_v45 }
 0x29f   : > { %2616 = vst [vmem:[%s4401_s26] sm:$0xff] %v2615_v9  }
 0x2a4   : > { %v3183_v32 = vpop.f32.mrf.mxu0 }
 0x2a5   : > { %v2160_v44 = vmul.f32 %v3183_v32, %v4189_v42 }
 0x2a6   : > { %v2043_v60 = vpop.f32.mrf.mxu0 }
 0x2a7   : > { %v2158_v14 = vmul.f32 %v2043_v60, %v4170_v6 }
 0x2a8   : > { %v3184_v19 = vpop.f32.mrf.mxu0 }
 0x2a9   : > { %v2161_v12 = vmul.f32 %v3184_v19, %v4196_v4 }
 0x2aa   : > { %v2046_v53 = vpop.f32.mrf.mxu0 }
 0x2ab   : > { %v2630_v27 = vpack.c.bf16 %v2161_v12, %v2160_v44  ;;  %v2159_v57 = vmul.f32 %v2046_v53, %v4177_v62 }
 0x2ad   : > { %2694 = vst [vmem:[%s4401_s26 + $0x18] sm:$0xff] %v2630_v27   ;;  %v2625_v49 = vpack.c.bf16 %v2159_v57, %v2158_v14 }
 0x2af   : > { %2693 = vst [vmem:[%s4401_s26 + $0x10] sm:$0xff] %v2625_v49  }
 0x2b4   : > { %v3187_v18 = vpop.f32.mrf.mxu0 }
 0x2b5   : > { %v2164_v16 = vmul.f32 %v3187_v18, %v4227_v11 }
 0x2b6   : > { %v2059_v31 = vpop.f32.mrf.mxu0 }
 0x2b7   : > { %v2162_v4 = vmul.f32 %v2059_v31, %v4208_v47 }
 0x2b8   : > { %v3188_v30 = vpop.f32.mrf.mxu0 }
 0x2b9   : > { %v2165_v42 = vmul.f32 %v3188_v30, %v4234_v17 }
 0x2ba   : > { %v2062_v63 = vpop.f32.mrf.mxu0 }
 0x2bb   : > { %v2640_v36 = vpack.c.bf16 %v2165_v42, %v2164_v16  ;;  %v2163_v6 = vmul.f32 %v2062_v63, %v4215_v48 }
 0x2bd   : > { %2696 = vst [vmem:[%s4401_s26 + $0x28] sm:$0xff] %v2640_v36   ;;  %v2635_v62 = vpack.c.bf16 %v2163_v6, %v2162_v4 }
 0x2bf   : > { %2695 = vst [vmem:[%s4401_s26 + $0x20] sm:$0xff] %v2635_v62  }
 0x2c4   : > { %v3191_v7 = vpop.f32.mrf.mxu0 }
 0x2c5   : > { %v2168_v2 = vmul.f32 %v3191_v7, %v4265_v38 }
 0x2c6   : > { %v2075_v50 = vpop.f32.mrf.mxu0 }
 0x2c7   : > { %v2166_v17 = vmul.f32 %v2075_v50, %v4246_v52 }
 0x2c8   : > { %v3192_v29 = vpop.f32.mrf.mxu0 }
 0x2c9   : > { %v2169_v11 = vmul.f32 %v3192_v29, %v4272_v61 }
 0x2ca   : > { %v2078_v0 = vpop.f32.mrf.mxu0 }
 0x2cb   : > { %v2650_v8 = vpack.c.bf16 %v2169_v11, %v2168_v2  ;;  %v2167_v47 = vmul.f32 %v2078_v0, %v4253_v41 }
 0x2cd   : > { %2698 = vst [vmem:[%s4401_s26 + $0x38] sm:$0xff] %v2650_v8   ;;  %v2645_v48 = vpack.c.bf16 %v2167_v47, %v2166_v17 }
 0x2cf   : > { %2697 = vst [vmem:[%s4401_s26 + $0x30] sm:$0xff] %v2645_v48  }
 0x2d4   : > { %v3195_v51 = vpop.f32.mrf.mxu0 }
 0x2d5   : > { %v2172_v54 = vmul.f32 %v3195_v51, %v4303_v1 }
 0x2d6   : > { %v2091_v23 = vpop.f32.mrf.mxu0 }
 0x2d7   : > { %v2170_v61 = vmul.f32 %v2091_v23, %v4284_v39 }
 0x2d8   : > { %v3196_v35 = vpop.f32.mrf.mxu0 }
 0x2d9   : > { %v2173_v38 = vmul.f32 %v3196_v35, %v4310_v56 }
 0x2da   : > { %v2094_v40 = vpop.f32.mrf.mxu0 }
 0x2db   : > { %v2660_v43 = vpack.c.bf16 %v2173_v38, %v2172_v54  ;;  %v2171_v52 = vmul.f32 %v2094_v40, %v4291_v20 }
 0x2dd   : > { %2700 = vst [vmem:[%s4401_s26 + $0x48] sm:$0xff] %v2660_v43   ;;  %v2655_v41 = vpack.c.bf16 %v2171_v52, %v2170_v61 }
 0x2df   : > { %2699 = vst [vmem:[%s4401_s26 + $0x40] sm:$0xff] %v2655_v41  }
 0x2e4   : > { %v3199_v59 = vpop.f32.mrf.mxu0 }
 0x2e5   : > { %v2176_v45 = vmul.f32 %v3199_v59, %v4337_v15 }
 0x2e6   : > { %v2107_v13 = vpop.f32.mrf.mxu0 }
 0x2e7   : > { %v2174_v56 = vmul.f32 %v2107_v13, %v4322_v46 }
 0x2e8   : > { %v3200_v21 = vpop.f32.mrf.mxu0 }
 0x2e9   : > { %v2177_v1 = vmul.f32 %v3200_v21, %v4342_v10 }
 0x2ea   : > { %v2110_v24 = vpop.f32.mrf.mxu0 }
 0x2eb   : > { %v2670_v26 = vpack.c.bf16 %v2177_v1, %v2176_v45  ;;  %v2175_v39 = vmul.f32 %v2110_v24, %v4327_v33 }
 0x2ed   : > { %2702 = vst [vmem:[%s4401_s26 + $0x58] sm:$0xff] %v2670_v26   ;;  %v2665_v20 = vpack.c.bf16 %v2175_v39, %v2174_v56 }
 0x2ef   : > { %2701 = vst [vmem:[%s4401_s26 + $0x50] sm:$0xff] %v2665_v20  }
 0x2f4   : > { %v3203_v22 = vpop.f32.mrf.mxu0 }
 0x2f5   : > { %v2180_v15 = vmul.f32 %v3203_v22, %v4364_v58 }
 0x2f6   : > { %v2123_v9 = vpop.f32.mrf.mxu0 }
 0x2f7   : > { %v2178_v19 = vmul.f32 %v2123_v9, %v4352_v37 }
 0x2f8   : > { %v3204_v32 = vpop.f32.mrf.mxu0 }
 0x2f9   : > { %v2181_v10 = vmul.f32 %v3204_v32, %v4367_v3 }
 0x2fa   : > { %v2126_v60 = vpop.f32.mrf.mxu0 }
 0x2fb   : > { %v2680_v46 = vpack.c.bf16 %v2181_v10, %v2180_v15  ;;  %v2179_v44 = vmul.f32 %v2126_v60, %v4356_v5 }
 0x2fd   : > { %2704 = vst [vmem:[%s4401_s26 + $0x68] sm:$0xff] %v2680_v46   ;;  %v2675_v33 = vpack.c.bf16 %v2179_v44, %v2178_v19 }
 0x2ff   : > { %2703 = vst [vmem:[%s4401_s26 + $0x60] sm:$0xff] %v2675_v33  }
 0x304   : > { %v3207_v12 = vpop.f32.mrf.mxu0 }
 0x305   : > { %v2184_v27 = vmul.f32 %v3207_v12, %v4386_v28 }
 0x306   : > { %v2139_v53 = vpop.f32.mrf.mxu0 }
 0x307   : > { %v2182_v3 = vmul.f32 %v2139_v53, %v4375_v25 }
 0x308   : > { %v3208_v14 = vpop.f32.mrf.mxu0 }
 0x309   : > { %v2185_v58 = vmul.f32 %v3208_v14, %v4389_v34 }
 0x30a   : > { %v2142_v37 = vpop.f32.mrf.mxu0 }
 0x30b   : > { %v2690_v5 = vpack.c.bf16 %v2185_v58, %v2184_v27  ;;  %v2183_v57 = vmul.f32 %v2142_v37, %v4378_v55 }
 0x30d   : > { %2706 = vst [vmem:[%s4401_s26 + $0x78] sm:$0xff] %v2690_v5   ;;  %v2685_v28 = vpack.c.bf16 %v2183_v57, %v2182_v3 }
 0x30f   : > { %2705 = vst [vmem:[%s4401_s26 + $0x70] sm:$0xff] %v2685_v28  }
 0x310   : > { %3385 = shalt.err (!%p3382_p13)
}
 0x311   : > { %s3386_s11 = scalar_lea.hbm %s4450_s8, 2048  ;;  %s3390_s17 = scalar_lea.hbm %s4501_s5, 8192 }
 0x312   : > { %p3387_p1 = scmp.ne.s32.totalorder %s4450_s8, %s3386_s11  ;;  %p3391_p3 = scmp.lt.s32.totalorder %s4450_s8, %s4501_s5 }
 0x313   : > { %p3392_p6 = scmp.lt.s32.totalorder %s3390_s17, %s3386_s11 }
 0x314   : > { %p3388_p0 = pnand %p3387_p1, %p4545_p12 }
 0x315   : > { %p3393_p10 = por %p3392_p6, %p3391_p3 }
 0x316   : > { %p3389_p2 = pneg %p3388_p0 }
 0x318   : > { %p3394_p11 = pnand %p3393_p10, %p3389_p2 }
 0x31a   : > { %3397 = shalt.err (!%p3394_p11)
}
 0x31b   : > { %s3443_s12 = smov 64   ;;  %s3444_s15 = smov 4  }
 0x31c   : > { %3227 = dma.vmem_to_hbm [thread:$0]  (%p4545_p12), %s4452_s14, 2048, %s4450_s8, %s2347_s22, %s3443_s12, %s3443_s12, %s3444_s15  }
 0x31d PF: > { %p3238_p4 = scmp.ge.s32.totalorder %s3436_s21, 2  ;;  %s2375_s16 = sand.u32 1, %s3424_s18  }
 0x31e   : > { %p4546_p5 = scmp.ne.s32.totalorder %s4508_s6, 0  ;;  %s2376_s7 = scalar_lea.sflag [#allocation4], %s2375_s16 }
 0x320   : > { %p3234_p7 = pnand %p3238_p4, %p4546_p5 }
 0x322   : > { %p3235_p8 = pneg %p3234_p7 }
 0x324   : > { %3419 = dma.done.wait (%p3235_p8), %s2376_s7, 2048  }
 0x325   : > { %3421 = vsyncadd (%p3235_p8), %s2376_s7, 4294965248  ;;  %p18_p9 = scmp.ge.s32.totalorder %s3500_s24, 6   ;;  %s4547_s18 = smov %s3428_s19 }
 0x326   : > { %s4548_s19 = smov %s3432_s20  ;;  %s4549_s20 = smov %s3512_s27 }
 0x327   : > { %s4550_s21 = smov %s3500_s24  ;;  %20 = sbr.rel (!%p18_p9) target bundleno = 5 (0x5), region = 88 }
 0x32c   :  { %2381 = vsyncpa [#allocation3], 1 }
 0x32d   :  { %2383 = vsyncpa [#allocation3 + $0x1], 1 }
 0x32e   :  { %2384 = vsyncpa [#allocation4], 1 }
 0x32f   :  { %2386 = vsyncpa [#allocation4 + $0x1], 1 }

</bundles_post_ra>
